<compile_context>
chip_gen: v7x
topology: tpu7x:2x2x1
jax: 0.10.0
libtpu: 0.0.40
codegen_flags: <defaults>
</compile_context>

<pallas_src>
import functools
import jax
import jax.numpy as jnp
from jax.experimental import pallas as pl
from jax.experimental.pallas import tpu as pltpu

LANE = 128  # TPU lane width; every feature dim is zero-padded to this.

_VMEM = pl.BlockSpec(memory_space=pltpu.MemorySpace.VMEM)


# ------------------------------ fused Pallas kernel ------------------------------

def _policy_fused_kernel(obs_ref, adj_ref, wc_ref, wl_ref, bias_ref, sel_ref,
                         o_ref, *, n_half):
    """Entire PolicyNet forward; activations never leave VMEM.

    adj_ref : [3, N, N]   bf16   (0=eit, 1=eic, 2=eid)
    wc_ref  : [5, 256,128] bf16  row-stacked [W_self; W_nbr] per conv
    wl_ref  : [6, 128,128] bf16  lin2, lin3, lins0, lins1, lin1_start, lin1_dest
    bias_ref: [16, 128]   f32    rows 0-4 conv biases, rows 5-10 linear biases
    sel_ref : [2, B*A_pad, N] f32 one-hot gather matrices (start / dest)
    """
    f32 = jnp.float32
    bf16 = jnp.bfloat16

    def bias(row):
        # static row -> zero-cost (1, 128) view of the stacked bias slab
        return bias_ref[pl.ds(row, 1), :]

    def gconv(x, ai, ci):
        # GraphConv (sum aggregation); the two weight matmuls fused into one
        # MXU call via lane-concat + row-stacked (padded) weights.
        xb = x.astype(bf16)
        agg = jnp.dot(adj_ref[ai], xb, preferred_element_type=f32)        # A @ x
        xa = jnp.concatenate([xb, agg.astype(bf16)], axis=-1)             # [N, 256]
        out = jnp.dot(xa, wc_ref[ci], preferred_element_type=f32) + bias(ci)
        return jnp.maximum(out, 0.0)

    def linear(x, li, relu):
        out = jnp.dot(x.astype(bf16), wl_ref[li],
                      preferred_element_type=f32) + bias(5 + li)
        return jnp.maximum(out, 0.0) if relu else out

    x = obs_ref[...]
    x = gconv(x, 0, 0)            # conv1(obs, eit)
    x = gconv(x, 1, 1)            # conv2(x, eic)
    x = gconv(x, 2, 2)            # conv3(x, eid)
    x = linear(x, 0, True)        # lin2
    x = gconv(x, 0, 2)            # conv3 reused with eit (as in the reference)
    x = gconv(x, 1, 3)            # conv4(x, eic)
    x = gconv(x, 2, 4)            # conv5(x, eid)
    x = linear(x, 1, True)        # lin3
    x = linear(x, 2, False)       # lins[0]
    x = linear(x, 3, False)       # lins[1]

    # lin1 applied with column-split (start / dest half) weights so both halves
    # of the action vector land lane-aligned at columns [0, n_half).
    x_start = linear(x, 4, False)   # [N, 128]
    x_dest = linear(x, 5, False)    # [N, 128]

    # to_dense_batch + the flattened-action gathers expressed as one-hot
    # selection matmuls (zero rows == to_dense_batch padding / padded actions).
    g0 = jnp.dot(sel_ref[0], x_start, preferred_element_type=f32)  # [B*A_pad, 128]
    g1 = jnp.dot(sel_ref[1], x_dest, preferred_element_type=f32)   # [B*A_pad, 128]

    num_graphs = o_ref.shape[0]
    acts_pad = g0.shape[0] // num_graphs
    prod = (g0 * g1).reshape(num_graphs, acts_pad, LANE)
    s = jnp.sum(prod, axis=1)                                       # [B, 128]

    # softmax over the first n_half lanes only (rest is lane padding)
    lane_idx = jax.lax.broadcasted_iota(jnp.int32, s.shape, 1)
    valid = lane_idx < n_half
    sm = jnp.where(valid, s, jnp.float32(-1e30))
    m = jnp.max(sm, axis=-1, keepdims=True)
    e = jnp.where(valid, jnp.exp(sm - m), 0.0)
    denom = jnp.sum(e, axis=-1, keepdims=True)
    o_ref[...] = e * pl.reciprocal(denom, approx=True)


def _fused_call(kernel_inputs, num_graphs, n_half):
    return pl.pallas_call(
        functools.partial(_policy_fused_kernel, n_half=n_half),
        out_shape=jax.ShapeDtypeStruct((num_graphs, LANE), jnp.float32),
        in_specs=[_VMEM] * len(kernel_inputs),
        out_specs=_VMEM,
        compiler_params=pltpu.CompilerParams(
            vmem_limit_bytes=32 * 1024 * 1024,
        ),
    )(*kernel_inputs)


# ------------------------------- JAX glue ----------------------------------------

def _pad2(a, rows, cols, dtype=jnp.float32):
    a = jnp.asarray(a)
    out = jnp.zeros((rows, cols), a.dtype)
    out = out.at[: a.shape[0], : a.shape[1]].set(a)
    return out.astype(dtype)


def prepare_params(params, n_half):
    """Stack / zero-pad / bf16-cast raw parameters into 3 VMEM-resident slabs."""
    conv_w, biases = [], []
    for name in ("conv1", "conv2", "conv3", "conv4", "conv5"):
        w_self, w_nbr, b = params[name]
        wc = jnp.zeros((2 * LANE, LANE), jnp.float32)
        wc = wc.at[: w_self.shape[0], : w_self.shape[1]].set(w_self)
        wc = wc.at[LANE: LANE + w_nbr.shape[0], : w_nbr.shape[1]].set(w_nbr)
        conv_w.append(wc)
        biases.append(_pad2(b, 1, LANE))

    lin_w = []
    for name in ("lin2", "lin3", "lins0", "lins1"):
        w, b = params[name]
        lin_w.append(_pad2(w, LANE, LANE))
        biases.append(_pad2(b, 1, LANE))

    # lin1 split into start / dest column halves, both lane-aligned at col 0.
    w1, b1 = params["lin1"]
    lin_w.append(_pad2(w1[:, :n_half], LANE, LANE))
    biases.append(_pad2(b1[:, :n_half], 1, LANE))
    lin_w.append(_pad2(w1[:, n_half:], LANE, LANE))
    biases.append(_pad2(b1[:, n_half:], 1, LANE))

    conv_w_stack = jnp.stack(conv_w).astype(jnp.bfloat16)   # [5, 256, 128]
    lin_w_stack = jnp.stack(lin_w).astype(jnp.bfloat16)     # [6, 128, 128]
    bias_stack = jnp.concatenate(biases, axis=0)            # [11, 128]
    bias_stack = jnp.pad(
        bias_stack, ((0, 16 - bias_stack.shape[0]), (0, 0)))  # [16, 128] f32
    return {"conv_w": conv_w_stack, "lin_w": lin_w_stack, "bias": bias_stack}


def edge_index_to_adj(edge_index, num_nodes):
    src, dst = edge_index[0], edge_index[1]
    adj = jnp.zeros((num_nodes, num_nodes), jnp.float32)
    return adj.at[dst, src].add(1.0).astype(jnp.bfloat16)   # small counts: exact in bf16


def _selection_matrices(batch, actions, num_graphs, num_nodes):
    """One-hot [B*A_pad, N] matrices realizing to_dense_batch + the PyTorch gather
    dense[:, actions[:, :, k].flatten()] (flattened indices broadcast over batch;
    empty dense slots -> zero rows, matching to_dense_batch zero padding)."""
    one_hot_b = (batch[:, None] == jnp.arange(num_graphs)[None, :]).astype(jnp.int32)
    pos = jnp.cumsum(one_hot_b, axis=0)[jnp.arange(num_nodes), batch] - 1   # slot in graph

    n_act = actions.shape[0] * actions.shape[1]
    acts_pad = ((n_act + 7) // 8) * 8          # keep sublane dim a multiple of 8

    def sel_for(idx_flat):
        sel = ((batch[None, None, :] == jnp.arange(num_graphs)[:, None, None])
               & (pos[None, None, :] == idx_flat[None, :, None])).astype(jnp.float32)
        sel_p = jnp.zeros((num_graphs, acts_pad, num_nodes), jnp.float32)
        sel_p = sel_p.at[:, :n_act, :].set(sel)
        return sel_p.reshape(num_graphs * acts_pad, num_nodes)

    return (sel_for(actions[:, :, 0].reshape(-1)),
            sel_for(actions[:, :, 1].reshape(-1)))


def policy_net_forward(prepped, actions, obs, eic, eid, eit, batch,
                       *, num_graphs, n_half):
    num_nodes = obs.shape[0]
    adj = jnp.stack([
        edge_index_to_adj(eit, num_nodes),   # 0: eit
        edge_index_to_adj(eic, num_nodes),   # 1: eic
        edge_index_to_adj(eid, num_nodes),   # 2: eid
    ])
    obs_pad = _pad2(obs, num_nodes, LANE)
    sel0, sel1 = _selection_matrices(batch, actions, num_graphs, num_nodes)
    sel = jnp.stack([sel0, sel1])

    inputs = [obs_pad, adj, prepped["conv_w"], prepped["lin_w"],
              prepped["bias"], sel]
    probs_pad = _fused_call(inputs, num_graphs, n_half)   # [B, 128], lane-dense store
    return probs_pad[:, :n_half]


# ------------------------------- Parameters --------------------------------------

def init_params(key, n_node_features, hidden, action_vector_size):
    names_conv = ["conv1", "conv2", "conv3", "conv4", "conv5"]
    params = {}
    keys = jax.random.split(key, len(names_conv) * 3 + 5 * 2)
    ki = 0

    def nxt():
        nonlocal ki
        k = keys[ki]
        ki += 1
        return k

    for name in names_conv:
        fin = n_node_features if name == "conv1" else hidden
        scale = 1.0 / (fin ** 0.5)
        params[name] = (
            jax.random.normal(nxt(), (fin, hidden), jnp.float32) * scale,
            jax.random.normal(nxt(), (fin, hidden), jnp.float32) * scale,
            jax.random.normal(nxt(), (1, hidden), jnp.float32) * 0.01,
        )
    for name, (fin, fout) in {
        "lin2": (hidden, hidden),
        "lin3": (hidden, hidden),
        "lins0": (hidden, hidden),
        "lins1": (hidden, hidden),
        "lin1": (hidden, action_vector_size),
    }.items():
        scale = 1.0 / (fin ** 0.5)
        params[name] = (
            jax.random.normal(nxt(), (fin, fout), jnp.float32) * scale,
            jax.random.normal(nxt(), (1, fout), jnp.float32) * 0.01,
        )
    return params


# ------------------------------- Main ---------------------------------------------

if __name__ == "__main__":
    n_node_features = 8
    hidden_neurons = 32
    action_vector_size = 16
    n_half = action_vector_size // 2
    num_graphs = 2
    nodes_per_graph = 8
    num_nodes = num_graphs * nodes_per_graph
    num_actions = 4

    key = jax.random.PRNGKey(0)
    k_param, k_obs, k_e1, k_e2, k_e3, k_act = jax.random.split(key, 6)

    params = init_params(k_param, n_node_features, hidden_neurons, action_vector_size)
    prepped = prepare_params(params, n_half)

    obs = jax.random.normal(k_obs, (num_nodes, n_node_features), jnp.float32)

    # batch assignment: first 8 nodes -> graph 0, next 8 -> graph 1
    batch = jnp.concatenate([
        jnp.zeros((nodes_per_graph,), jnp.int32),
        jnp.ones((nodes_per_graph,), jnp.int32),
    ])

    def random_edges(k, n_edges):
        # edges stay within each graph
        ks, kd, kg = jax.random.split(k, 3)
        g = jax.random.randint(kg, (n_edges,), 0, num_graphs)
        src = jax.random.randint(ks, (n_edges,), 0, nodes_per_graph) + g * nodes_per_graph
        dst = jax.random.randint(kd, (n_edges,), 0, nodes_per_graph) + g * nodes_per_graph
        return jnp.stack([src, dst]).astype(jnp.int32)

    eic = random_edges(k_e1, 24)
    eid = random_edges(k_e2, 24)
    eit = random_edges(k_e3, 24)

    # actions: [B, A, 2], indices into the dense-batch node axis (< max_nodes)
    actions = jax.random.randint(
        k_act, (num_graphs, num_actions, 2), 0, nodes_per_graph
    ).astype(jnp.int32)

    fwd = jax.jit(functools.partial(policy_net_forward,
                                    num_graphs=num_graphs, n_half=n_half))
    probs = fwd(prepped, actions, obs, eic, eid, eit, batch)
    probs = jax.block_until_ready(probs)

    assert probs.shape == (num_graphs, n_half)
    assert bool(jnp.all(jnp.isfinite(probs)))
    # approx reciprocal in the softmax -> allow a slightly loose sum tolerance
    assert bool(jnp.allclose(jnp.sum(probs, axis=-1), 1.0, atol=1e-2))
    print("KERNEL_OK")
</pallas_src>

<mosaic_0001>
module attributes {stable_mosaic.version = 11 : i64} {
  func.func @_policy_fused_kernel(%arg0: memref<16x128xf32, #tpu.memory_space<vmem>>, %arg1: memref<3x16x16xbf16, #tpu.memory_space<vmem>>, %arg2: memref<5x256x128xbf16, #tpu.memory_space<vmem>>, %arg3: memref<6x128x128xbf16, #tpu.memory_space<vmem>>, %arg4: memref<16x128xf32, #tpu.memory_space<vmem>>, %arg5: memref<2x16x16xf32, #tpu.memory_space<vmem>>, %arg6: memref<2x128xf32, #tpu.memory_space<vmem>>) attributes {dimension_semantics = [], scalar_prefetch = 0 : i64, scratch_operands = 0 : i64, tpu.core_type = #tpu.core_type<tc>} {
    %c0 = arith.constant 0 : index
    %c0_0 = arith.constant 0 : index
    %0 = vector.load %arg0[%c0, %c0_0] : memref<16x128xf32, #tpu.memory_space<vmem>>, vector<16x128xf32>
    %1 = arith.truncf %0 : vector<16x128xf32> to vector<16x128xbf16>
    %c0_1 = arith.constant 0 : index
    %c0_2 = arith.constant 0 : index
    %c0_3 = arith.constant 0 : index
    %2 = vector.load %arg1[%c0_1, %c0_2, %c0_3] : memref<3x16x16xbf16, #tpu.memory_space<vmem>>, vector<1x16x16xbf16>
    %3 = vector.shape_cast %2 : vector<1x16x16xbf16> to vector<16x16xbf16>
    %cst = arith.constant dense<0.000000e+00> : vector<16x128xf32>
    %4 = tpu.matmul %3, %1, %cst {dimension_numbers = #tpu.dot_dimension_numbers<[1], [0], [0], [1], [0, 0, 1, 1], [], []>} : vector<16x16xbf16>, vector<16x128xbf16>, vector<16x128xf32> -> vector<16x128xf32>
    %5 = arith.truncf %4 : vector<16x128xf32> to vector<16x128xbf16>
    %6 = tpu.concatenate %1, %5 in 1 : vector<16x128xbf16>, vector<16x128xbf16> -> vector<16x256xbf16>
    %c0_4 = arith.constant 0 : index
    %c0_5 = arith.constant 0 : index
    %c0_6 = arith.constant 0 : index
    %7 = vector.load %arg2[%c0_4, %c0_5, %c0_6] : memref<5x256x128xbf16, #tpu.memory_space<vmem>>, vector<1x256x128xbf16>
    %8 = vector.shape_cast %7 : vector<1x256x128xbf16> to vector<256x128xbf16>
    %cst_7 = arith.constant dense<0.000000e+00> : vector<16x128xf32>
    %9 = tpu.matmul %6, %8, %cst_7 {dimension_numbers = #tpu.dot_dimension_numbers<[1], [0], [0], [1], [0, 0, 1, 1], [], []>} : vector<16x256xbf16>, vector<256x128xbf16>, vector<16x128xf32> -> vector<16x128xf32>
    %c0_8 = arith.constant 0 : index
    %c0_9 = arith.constant 0 : index
    %10 = vector.load %arg4[%c0_8, %c0_9] : memref<16x128xf32, #tpu.memory_space<vmem>>, vector<1x128xf32>
    %11 = vector.broadcast %10 : vector<1x128xf32> to vector<16x128xf32>
    %12 = arith.addf %9, %11 : vector<16x128xf32>
    %cst_10 = arith.constant 0.000000e+00 : f32
    %13 = vector.broadcast %cst_10 : f32 to vector<16x128xf32>
    %14 = arith.maximumf %12, %13 : vector<16x128xf32>
    %15 = arith.truncf %14 : vector<16x128xf32> to vector<16x128xbf16>
    %c1 = arith.constant 1 : index
    %c0_11 = arith.constant 0 : index
    %c0_12 = arith.constant 0 : index
    %16 = vector.load %arg1[%c1, %c0_11, %c0_12] : memref<3x16x16xbf16, #tpu.memory_space<vmem>>, vector<1x16x16xbf16>
    %17 = vector.shape_cast %16 : vector<1x16x16xbf16> to vector<16x16xbf16>
    %cst_13 = arith.constant dense<0.000000e+00> : vector<16x128xf32>
    %18 = tpu.matmul %17, %15, %cst_13 {dimension_numbers = #tpu.dot_dimension_numbers<[1], [0], [0], [1], [0, 0, 1, 1], [], []>} : vector<16x16xbf16>, vector<16x128xbf16>, vector<16x128xf32> -> vector<16x128xf32>
    %19 = arith.truncf %18 : vector<16x128xf32> to vector<16x128xbf16>
    %20 = tpu.concatenate %15, %19 in 1 : vector<16x128xbf16>, vector<16x128xbf16> -> vector<16x256xbf16>
    %c1_14 = arith.constant 1 : index
    %c0_15 = arith.constant 0 : index
    %c0_16 = arith.constant 0 : index
    %21 = vector.load %arg2[%c1_14, %c0_15, %c0_16] : memref<5x256x128xbf16, #tpu.memory_space<vmem>>, vector<1x256x128xbf16>
    %22 = vector.shape_cast %21 : vector<1x256x128xbf16> to vector<256x128xbf16>
    %cst_17 = arith.constant dense<0.000000e+00> : vector<16x128xf32>
    %23 = tpu.matmul %20, %22, %cst_17 {dimension_numbers = #tpu.dot_dimension_numbers<[1], [0], [0], [1], [0, 0, 1, 1], [], []>} : vector<16x256xbf16>, vector<256x128xbf16>, vector<16x128xf32> -> vector<16x128xf32>
    %c1_18 = arith.constant 1 : index
    %c0_19 = arith.constant 0 : index
    %24 = vector.load %arg4[%c1_18, %c0_19] : memref<16x128xf32, #tpu.memory_space<vmem>>, vector<1x128xf32>
    %25 = vector.broadcast %24 : vector<1x128xf32> to vector<16x128xf32>
    %26 = arith.addf %23, %25 : vector<16x128xf32>
    %cst_20 = arith.constant 0.000000e+00 : f32
    %27 = vector.broadcast %cst_20 : f32 to vector<16x128xf32>
    %28 = arith.maximumf %26, %27 : vector<16x128xf32>
    %29 = arith.truncf %28 : vector<16x128xf32> to vector<16x128xbf16>
    %c2 = arith.constant 2 : index
    %c0_21 = arith.constant 0 : index
    %c0_22 = arith.constant 0 : index
    %30 = vector.load %arg1[%c2, %c0_21, %c0_22] : memref<3x16x16xbf16, #tpu.memory_space<vmem>>, vector<1x16x16xbf16>
    %31 = vector.shape_cast %30 : vector<1x16x16xbf16> to vector<16x16xbf16>
    %cst_23 = arith.constant dense<0.000000e+00> : vector<16x128xf32>
    %32 = tpu.matmul %31, %29, %cst_23 {dimension_numbers = #tpu.dot_dimension_numbers<[1], [0], [0], [1], [0, 0, 1, 1], [], []>} : vector<16x16xbf16>, vector<16x128xbf16>, vector<16x128xf32> -> vector<16x128xf32>
    %33 = arith.truncf %32 : vector<16x128xf32> to vector<16x128xbf16>
    %34 = tpu.concatenate %29, %33 in 1 : vector<16x128xbf16>, vector<16x128xbf16> -> vector<16x256xbf16>
    %c2_24 = arith.constant 2 : index
    %c0_25 = arith.constant 0 : index
    %c0_26 = arith.constant 0 : index
    %35 = vector.load %arg2[%c2_24, %c0_25, %c0_26] : memref<5x256x128xbf16, #tpu.memory_space<vmem>>, vector<1x256x128xbf16>
    %36 = vector.shape_cast %35 : vector<1x256x128xbf16> to vector<256x128xbf16>
    %cst_27 = arith.constant dense<0.000000e+00> : vector<16x128xf32>
    %37 = tpu.matmul %34, %36, %cst_27 {dimension_numbers = #tpu.dot_dimension_numbers<[1], [0], [0], [1], [0, 0, 1, 1], [], []>} : vector<16x256xbf16>, vector<256x128xbf16>, vector<16x128xf32> -> vector<16x128xf32>
    %c2_28 = arith.constant 2 : index
    %c0_29 = arith.constant 0 : index
    %38 = vector.load %arg4[%c2_28, %c0_29] : memref<16x128xf32, #tpu.memory_space<vmem>>, vector<1x128xf32>
    %39 = vector.broadcast %38 : vector<1x128xf32> to vector<16x128xf32>
    %40 = arith.addf %37, %39 : vector<16x128xf32>
    %cst_30 = arith.constant 0.000000e+00 : f32
    %41 = vector.broadcast %cst_30 : f32 to vector<16x128xf32>
    %42 = arith.maximumf %40, %41 : vector<16x128xf32>
    %43 = arith.truncf %42 : vector<16x128xf32> to vector<16x128xbf16>
    %c0_31 = arith.constant 0 : index
    %c0_32 = arith.constant 0 : index
    %c0_33 = arith.constant 0 : index
    %44 = vector.load %arg3[%c0_31, %c0_32, %c0_33] : memref<6x128x128xbf16, #tpu.memory_space<vmem>>, vector<1x128x128xbf16>
    %45 = vector.shape_cast %44 : vector<1x128x128xbf16> to vector<128x128xbf16>
    %cst_34 = arith.constant dense<0.000000e+00> : vector<16x128xf32>
    %46 = tpu.matmul %43, %45, %cst_34 {dimension_numbers = #tpu.dot_dimension_numbers<[1], [0], [0], [1], [0, 0, 1, 1], [], []>} : vector<16x128xbf16>, vector<128x128xbf16>, vector<16x128xf32> -> vector<16x128xf32>
    %c5 = arith.constant 5 : index
    %c0_35 = arith.constant 0 : index
    %47 = vector.load %arg4[%c5, %c0_35] : memref<16x128xf32, #tpu.memory_space<vmem>>, vector<1x128xf32>
    %48 = vector.broadcast %47 : vector<1x128xf32> to vector<16x128xf32>
    %49 = arith.addf %46, %48 : vector<16x128xf32>
    %cst_36 = arith.constant 0.000000e+00 : f32
    %50 = vector.broadcast %cst_36 : f32 to vector<16x128xf32>
    %51 = arith.maximumf %49, %50 : vector<16x128xf32>
    %52 = arith.truncf %51 : vector<16x128xf32> to vector<16x128xbf16>
    %c0_37 = arith.constant 0 : index
    %c0_38 = arith.constant 0 : index
    %c0_39 = arith.constant 0 : index
    %53 = vector.load %arg1[%c0_37, %c0_38, %c0_39] : memref<3x16x16xbf16, #tpu.memory_space<vmem>>, vector<1x16x16xbf16>
    %54 = vector.shape_cast %53 : vector<1x16x16xbf16> to vector<16x16xbf16>
    %cst_40 = arith.constant dense<0.000000e+00> : vector<16x128xf32>
    %55 = tpu.matmul %54, %52, %cst_40 {dimension_numbers = #tpu.dot_dimension_numbers<[1], [0], [0], [1], [0, 0, 1, 1], [], []>} : vector<16x16xbf16>, vector<16x128xbf16>, vector<16x128xf32> -> vector<16x128xf32>
    %56 = arith.truncf %55 : vector<16x128xf32> to vector<16x128xbf16>
    %57 = tpu.concatenate %52, %56 in 1 : vector<16x128xbf16>, vector<16x128xbf16> -> vector<16x256xbf16>
    %c2_41 = arith.constant 2 : index
    %c0_42 = arith.constant 0 : index
    %c0_43 = arith.constant 0 : index
    %58 = vector.load %arg2[%c2_41, %c0_42, %c0_43] : memref<5x256x128xbf16, #tpu.memory_space<vmem>>, vector<1x256x128xbf16>
    %59 = vector.shape_cast %58 : vector<1x256x128xbf16> to vector<256x128xbf16>
    %cst_44 = arith.constant dense<0.000000e+00> : vector<16x128xf32>
    %60 = tpu.matmul %57, %59, %cst_44 {dimension_numbers = #tpu.dot_dimension_numbers<[1], [0], [0], [1], [0, 0, 1, 1], [], []>} : vector<16x256xbf16>, vector<256x128xbf16>, vector<16x128xf32> -> vector<16x128xf32>
    %c2_45 = arith.constant 2 : index
    %c0_46 = arith.constant 0 : index
    %61 = vector.load %arg4[%c2_45, %c0_46] : memref<16x128xf32, #tpu.memory_space<vmem>>, vector<1x128xf32>
    %62 = vector.broadcast %61 : vector<1x128xf32> to vector<16x128xf32>
    %63 = arith.addf %60, %62 : vector<16x128xf32>
    %cst_47 = arith.constant 0.000000e+00 : f32
    %64 = vector.broadcast %cst_47 : f32 to vector<16x128xf32>
    %65 = arith.maximumf %63, %64 : vector<16x128xf32>
    %66 = arith.truncf %65 : vector<16x128xf32> to vector<16x128xbf16>
    %c1_48 = arith.constant 1 : index
    %c0_49 = arith.constant 0 : index
    %c0_50 = arith.constant 0 : index
    %67 = vector.load %arg1[%c1_48, %c0_49, %c0_50] : memref<3x16x16xbf16, #tpu.memory_space<vmem>>, vector<1x16x16xbf16>
    %68 = vector.shape_cast %67 : vector<1x16x16xbf16> to vector<16x16xbf16>
    %cst_51 = arith.constant dense<0.000000e+00> : vector<16x128xf32>
    %69 = tpu.matmul %68, %66, %cst_51 {dimension_numbers = #tpu.dot_dimension_numbers<[1], [0], [0], [1], [0, 0, 1, 1], [], []>} : vector<16x16xbf16>, vector<16x128xbf16>, vector<16x128xf32> -> vector<16x128xf32>
    %70 = arith.truncf %69 : vector<16x128xf32> to vector<16x128xbf16>
    %71 = tpu.concatenate %66, %70 in 1 : vector<16x128xbf16>, vector<16x128xbf16> -> vector<16x256xbf16>
    %c3 = arith.constant 3 : index
    %c0_52 = arith.constant 0 : index
    %c0_53 = arith.constant 0 : index
    %72 = vector.load %arg2[%c3, %c0_52, %c0_53] : memref<5x256x128xbf16, #tpu.memory_space<vmem>>, vector<1x256x128xbf16>
    %73 = vector.shape_cast %72 : vector<1x256x128xbf16> to vector<256x128xbf16>
    %cst_54 = arith.constant dense<0.000000e+00> : vector<16x128xf32>
    %74 = tpu.matmul %71, %73, %cst_54 {dimension_numbers = #tpu.dot_dimension_numbers<[1], [0], [0], [1], [0, 0, 1, 1], [], []>} : vector<16x256xbf16>, vector<256x128xbf16>, vector<16x128xf32> -> vector<16x128xf32>
    %c3_55 = arith.constant 3 : index
    %c0_56 = arith.constant 0 : index
    %75 = vector.load %arg4[%c3_55, %c0_56] : memref<16x128xf32, #tpu.memory_space<vmem>>, vector<1x128xf32>
    %76 = vector.broadcast %75 : vector<1x128xf32> to vector<16x128xf32>
    %77 = arith.addf %74, %76 : vector<16x128xf32>
    %cst_57 = arith.constant 0.000000e+00 : f32
    %78 = vector.broadcast %cst_57 : f32 to vector<16x128xf32>
    %79 = arith.maximumf %77, %78 : vector<16x128xf32>
    %80 = arith.truncf %79 : vector<16x128xf32> to vector<16x128xbf16>
    %c2_58 = arith.constant 2 : index
    %c0_59 = arith.constant 0 : index
    %c0_60 = arith.constant 0 : index
    %81 = vector.load %arg1[%c2_58, %c0_59, %c0_60] : memref<3x16x16xbf16, #tpu.memory_space<vmem>>, vector<1x16x16xbf16>
    %82 = vector.shape_cast %81 : vector<1x16x16xbf16> to vector<16x16xbf16>
    %cst_61 = arith.constant dense<0.000000e+00> : vector<16x128xf32>
    %83 = tpu.matmul %82, %80, %cst_61 {dimension_numbers = #tpu.dot_dimension_numbers<[1], [0], [0], [1], [0, 0, 1, 1], [], []>} : vector<16x16xbf16>, vector<16x128xbf16>, vector<16x128xf32> -> vector<16x128xf32>
    %84 = arith.truncf %83 : vector<16x128xf32> to vector<16x128xbf16>
    %85 = tpu.concatenate %80, %84 in 1 : vector<16x128xbf16>, vector<16x128xbf16> -> vector<16x256xbf16>
    %c4 = arith.constant 4 : index
    %c0_62 = arith.constant 0 : index
    %c0_63 = arith.constant 0 : index
    %86 = vector.load %arg2[%c4, %c0_62, %c0_63] : memref<5x256x128xbf16, #tpu.memory_space<vmem>>, vector<1x256x128xbf16>
    %87 = vector.shape_cast %86 : vector<1x256x128xbf16> to vector<256x128xbf16>
    %cst_64 = arith.constant dense<0.000000e+00> : vector<16x128xf32>
    %88 = tpu.matmul %85, %87, %cst_64 {dimension_numbers = #tpu.dot_dimension_numbers<[1], [0], [0], [1], [0, 0, 1, 1], [], []>} : vector<16x256xbf16>, vector<256x128xbf16>, vector<16x128xf32> -> vector<16x128xf32>
    %c4_65 = arith.constant 4 : index
    %c0_66 = arith.constant 0 : index
    %89 = vector.load %arg4[%c4_65, %c0_66] : memref<16x128xf32, #tpu.memory_space<vmem>>, vector<1x128xf32>
    %90 = vector.broadcast %89 : vector<1x128xf32> to vector<16x128xf32>
    %91 = arith.addf %88, %90 : vector<16x128xf32>
    %cst_67 = arith.constant 0.000000e+00 : f32
    %92 = vector.broadcast %cst_67 : f32 to vector<16x128xf32>
    %93 = arith.maximumf %91, %92 : vector<16x128xf32>
    %94 = arith.truncf %93 : vector<16x128xf32> to vector<16x128xbf16>
    %c1_68 = arith.constant 1 : index
    %c0_69 = arith.constant 0 : index
    %c0_70 = arith.constant 0 : index
    %95 = vector.load %arg3[%c1_68, %c0_69, %c0_70] : memref<6x128x128xbf16, #tpu.memory_space<vmem>>, vector<1x128x128xbf16>
    %96 = vector.shape_cast %95 : vector<1x128x128xbf16> to vector<128x128xbf16>
    %cst_71 = arith.constant dense<0.000000e+00> : vector<16x128xf32>
    %97 = tpu.matmul %94, %96, %cst_71 {dimension_numbers = #tpu.dot_dimension_numbers<[1], [0], [0], [1], [0, 0, 1, 1], [], []>} : vector<16x128xbf16>, vector<128x128xbf16>, vector<16x128xf32> -> vector<16x128xf32>
    %c6 = arith.constant 6 : index
    %c0_72 = arith.constant 0 : index
    %98 = vector.load %arg4[%c6, %c0_72] : memref<16x128xf32, #tpu.memory_space<vmem>>, vector<1x128xf32>
    %99 = vector.broadcast %98 : vector<1x128xf32> to vector<16x128xf32>
    %100 = arith.addf %97, %99 : vector<16x128xf32>
    %cst_73 = arith.constant 0.000000e+00 : f32
    %101 = vector.broadcast %cst_73 : f32 to vector<16x128xf32>
    %102 = arith.maximumf %100, %101 : vector<16x128xf32>
    %103 = arith.truncf %102 : vector<16x128xf32> to vector<16x128xbf16>
    %c2_74 = arith.constant 2 : index
    %c0_75 = arith.constant 0 : index
    %c0_76 = arith.constant 0 : index
    %104 = vector.load %arg3[%c2_74, %c0_75, %c0_76] : memref<6x128x128xbf16, #tpu.memory_space<vmem>>, vector<1x128x128xbf16>
    %105 = vector.shape_cast %104 : vector<1x128x128xbf16> to vector<128x128xbf16>
    %cst_77 = arith.constant dense<0.000000e+00> : vector<16x128xf32>
    %106 = tpu.matmul %103, %105, %cst_77 {dimension_numbers = #tpu.dot_dimension_numbers<[1], [0], [0], [1], [0, 0, 1, 1], [], []>} : vector<16x128xbf16>, vector<128x128xbf16>, vector<16x128xf32> -> vector<16x128xf32>
    %c7 = arith.constant 7 : index
    %c0_78 = arith.constant 0 : index
    %107 = vector.load %arg4[%c7, %c0_78] : memref<16x128xf32, #tpu.memory_space<vmem>>, vector<1x128xf32>
    %108 = vector.broadcast %107 : vector<1x128xf32> to vector<16x128xf32>
    %109 = arith.addf %106, %108 : vector<16x128xf32>
    %110 = arith.truncf %109 : vector<16x128xf32> to vector<16x128xbf16>
    %c3_79 = arith.constant 3 : index
    %c0_80 = arith.constant 0 : index
    %c0_81 = arith.constant 0 : index
    %111 = vector.load %arg3[%c3_79, %c0_80, %c0_81] : memref<6x128x128xbf16, #tpu.memory_space<vmem>>, vector<1x128x128xbf16>
    %112 = vector.shape_cast %111 : vector<1x128x128xbf16> to vector<128x128xbf16>
    %cst_82 = arith.constant dense<0.000000e+00> : vector<16x128xf32>
    %113 = tpu.matmul %110, %112, %cst_82 {dimension_numbers = #tpu.dot_dimension_numbers<[1], [0], [0], [1], [0, 0, 1, 1], [], []>} : vector<16x128xbf16>, vector<128x128xbf16>, vector<16x128xf32> -> vector<16x128xf32>
    %c8 = arith.constant 8 : index
    %c0_83 = arith.constant 0 : index
    %114 = vector.load %arg4[%c8, %c0_83] : memref<16x128xf32, #tpu.memory_space<vmem>>, vector<1x128xf32>
    %115 = vector.broadcast %114 : vector<1x128xf32> to vector<16x128xf32>
    %116 = arith.addf %113, %115 : vector<16x128xf32>
    %117 = arith.truncf %116 : vector<16x128xf32> to vector<16x128xbf16>
    %c4_84 = arith.constant 4 : index
    %c0_85 = arith.constant 0 : index
    %c0_86 = arith.constant 0 : index
    %118 = vector.load %arg3[%c4_84, %c0_85, %c0_86] : memref<6x128x128xbf16, #tpu.memory_space<vmem>>, vector<1x128x128xbf16>
    %119 = vector.shape_cast %118 : vector<1x128x128xbf16> to vector<128x128xbf16>
    %cst_87 = arith.constant dense<0.000000e+00> : vector<16x128xf32>
    %120 = tpu.matmul %117, %119, %cst_87 {dimension_numbers = #tpu.dot_dimension_numbers<[1], [0], [0], [1], [0, 0, 1, 1], [], []>} : vector<16x128xbf16>, vector<128x128xbf16>, vector<16x128xf32> -> vector<16x128xf32>
    %c9 = arith.constant 9 : index
    %c0_88 = arith.constant 0 : index
    %121 = vector.load %arg4[%c9, %c0_88] : memref<16x128xf32, #tpu.memory_space<vmem>>, vector<1x128xf32>
    %122 = vector.broadcast %121 : vector<1x128xf32> to vector<16x128xf32>
    %123 = arith.addf %120, %122 : vector<16x128xf32>
    %124 = arith.truncf %116 : vector<16x128xf32> to vector<16x128xbf16>
    %c5_89 = arith.constant 5 : index
    %c0_90 = arith.constant 0 : index
    %c0_91 = arith.constant 0 : index
    %125 = vector.load %arg3[%c5_89, %c0_90, %c0_91] : memref<6x128x128xbf16, #tpu.memory_space<vmem>>, vector<1x128x128xbf16>
    %126 = vector.shape_cast %125 : vector<1x128x128xbf16> to vector<128x128xbf16>
    %cst_92 = arith.constant dense<0.000000e+00> : vector<16x128xf32>
    %127 = tpu.matmul %124, %126, %cst_92 {dimension_numbers = #tpu.dot_dimension_numbers<[1], [0], [0], [1], [0, 0, 1, 1], [], []>} : vector<16x128xbf16>, vector<128x128xbf16>, vector<16x128xf32> -> vector<16x128xf32>
    %c10 = arith.constant 10 : index
    %c0_93 = arith.constant 0 : index
    %128 = vector.load %arg4[%c10, %c0_93] : memref<16x128xf32, #tpu.memory_space<vmem>>, vector<1x128xf32>
    %129 = vector.broadcast %128 : vector<1x128xf32> to vector<16x128xf32>
    %130 = arith.addf %127, %129 : vector<16x128xf32>
    %c0_94 = arith.constant 0 : index
    %c0_95 = arith.constant 0 : index
    %c0_96 = arith.constant 0 : index
    %131 = vector.load %arg5[%c0_94, %c0_95, %c0_96] : memref<2x16x16xf32, #tpu.memory_space<vmem>>, vector<1x16x16xf32>
    %132 = vector.shape_cast %131 : vector<1x16x16xf32> to vector<16x16xf32>
    %cst_97 = arith.constant dense<0.000000e+00> : vector<16x128xf32>
    %133 = tpu.matmul %132, %123, %cst_97 {dimension_numbers = #tpu.dot_dimension_numbers<[1], [0], [0], [1], [0, 0, 1, 1], [], []>} : vector<16x16xf32>, vector<16x128xf32>, vector<16x128xf32> -> vector<16x128xf32>
    %c1_98 = arith.constant 1 : index
    %c0_99 = arith.constant 0 : index
    %c0_100 = arith.constant 0 : index
    %134 = vector.load %arg5[%c1_98, %c0_99, %c0_100] : memref<2x16x16xf32, #tpu.memory_space<vmem>>, vector<1x16x16xf32>
    %135 = vector.shape_cast %134 : vector<1x16x16xf32> to vector<16x16xf32>
    %cst_101 = arith.constant dense<0.000000e+00> : vector<16x128xf32>
    %136 = tpu.matmul %135, %130, %cst_101 {dimension_numbers = #tpu.dot_dimension_numbers<[1], [0], [0], [1], [0, 0, 1, 1], [], []>} : vector<16x16xf32>, vector<16x128xf32>, vector<16x128xf32> -> vector<16x128xf32>
    %137 = arith.mulf %133, %136 : vector<16x128xf32>
    %138 = vector.shape_cast %137 : vector<16x128xf32> to vector<2x8x128xf32>
    %cst_102 = arith.constant dense<0.000000e+00> : vector<2x128xf32>
    %139 = vector.multi_reduction <add>, %138, %cst_102 [1] : vector<2x8x128xf32> to vector<2x128xf32>
    %140 = tpu.iota {dimensions = array<i32: 1>} : vector<2x128xi32>
    %c8_i32 = arith.constant 8 : i32
    %141 = vector.broadcast %c8_i32 : i32 to vector<2x128xi32>
    %142 = arith.cmpi slt, %140, %141 : vector<2x128xi32>
    %cst_103 = arith.constant -1.000000e+30 : f32
    %143 = vector.broadcast %cst_103 : f32 to vector<2x128xf32>
    %144 = arith.select %142, %139, %143 : vector<2x128xi1>, vector<2x128xf32>
    %cst_104 = arith.constant dense<0xFF800000> : vector<2xf32>
    %145 = vector.multi_reduction <maximumf>, %144, %cst_104 [1] : vector<2x128xf32> to vector<2xf32>
    %146 = vector.shape_cast %145 : vector<2xf32> to vector<2x1xf32>
    %147 = vector.broadcast %146 : vector<2x1xf32> to vector<2x128xf32>
    %148 = arith.subf %144, %147 : vector<2x128xf32>
    %149 = math.exp %148 : vector<2x128xf32>
    %cst_105 = arith.constant 0.000000e+00 : f32
    %150 = vector.broadcast %cst_105 : f32 to vector<2x128xf32>
    %151 = arith.select %142, %149, %150 : vector<2x128xi1>, vector<2x128xf32>
    %cst_106 = arith.constant dense<0.000000e+00> : vector<2xf32>
    %152 = vector.multi_reduction <add>, %151, %cst_106 [1] : vector<2x128xf32> to vector<2xf32>
    %153 = vector.shape_cast %152 : vector<2xf32> to vector<2x1xf32>
    %154 = tpu.reciprocal %153 {approx = true} : vector<2x1xf32> -> vector<2x1xf32>
    %155 = vector.broadcast %154 : vector<2x1xf32> to vector<2x128xf32>
    %156 = arith.mulf %151, %155 : vector<2x128xf32>
    %c0_107 = arith.constant 0 : index
    %c0_108 = arith.constant 0 : index
    %157 = vector.load %arg6[%c0_107, %c0_108] : memref<2x128xf32, #tpu.memory_space<vmem>>, vector<2x128xf32>
    tpu.vector_store %arg6[%c0_107, %c0_108], %156 {strides = array<i32>} : memref<2x128xf32, #tpu.memory_space<vmem>>, vector<2x128xf32>,
    return
  }
}

</mosaic_0001>

<bundles_post_ra>
// kernel: policy_net_forward.1
= control target key start
LH: loop header
LB: loop body
LE: loop exit
PB: predicated region body
PF: predicated region fallthrough
CT: control target
= control target key end

     0   :  { %v3049_v2 = vmov 0.0   ;;  %vm3050_vm0 = vmmov 0   ;;  %vm35_vm1 = vcmask 130048   ;;  %s3699_s0 = inlined_call_operand.vmem [shape: f32[16,128], index: 0, kind: input, shape index: {}]   ;;  %s3700_s1 = inlined_call_operand.vmem [shape: bf16[3,16,16], index: 1, kind: input, shape index: {}]   ;;  %s3701_s2 = inlined_call_operand.vmem [shape: bf16[5,256,128], index: 2, kind: input, shape index: {}]   ;;  %s3702_s3 = inlined_call_operand.vmem [shape: bf16[6,128,128], index: 3, kind: input, shape index: {}]   ;;  %s3703_s4 = inlined_call_operand.vmem [shape: f32[16,128], index: 4, kind: input, shape index: {}]   ;;  %s3704_s5 = inlined_call_operand.vmem [shape: f32[2,16,16], index: 5, kind: input, shape index: {}]   ;;  %s3705_s6 = inlined_call_operand.hbm [shape: f32[2,128], index: 6, kind: output, shape index: {}]  }
   0x1   :  { %v25_v0 = vld [vmem:[%s3699_s0] sm:$0xff]  ;;  %v26_v1 = vld [vmem:[%s3699_s0 + $0x8] sm:$0xff]  ;;  %2709 = vmatprep.subr.bf16.mxu0 %v3049_v2  ;;  %2711 = vmatprep.mubr.msk.bf16.mxu0 %vm3050_vm0, %v3049_v2  ;;  %v2895_v9 = vld [vmem:[%s3701_s2 + $0x50] sm:$0xff]  }
   0x2   :  { %v27_v3 = vpack.c.bf16 %v26_v1, %v25_v0  ;;  %v3099_v4 = vld [vmem:[%s3700_s1] sm:$0xff]   ;;  %v2893_v7 = vld [vmem:[%s3701_s2 + $0x48] sm:$0xff]   ;;  %v2896_v10 = vld [vmem:[%s3701_s2 + $0x10] sm:$0xff]  }
   0x3   :  { %v2891_v5 = vld [vmem:[%s3701_s2 + $0x40] sm:$0xff]   ;;  %v2894_v8 = vld [vmem:[%s3701_s2 + $0x8] sm:$0xff]   ;;  %v2897_v11 = vld [vmem:[%s3701_s2 + $0x58] sm:$0xff]  }
   0x4   :  { %2710 = vmatpush3.bf16.msra.mxu0 %v27_v3  ;;  %v2892_v6 = vld [vmem:[%s3701_s2] sm:$0xff]   ;;  %2505 = vmatprep.subr.bf16.mxu1 %v2891_v5  ;;  %v2898_v12 = vld [vmem:[%s3701_s2 + $0x18] sm:$0xff]   ;;  %v2901_v15 = vld [vmem:[%s3701_s2 + $0x68] sm:$0xff]  }
   0x5   :  { %2715 = vmatprep.subr.bf16.mxu0 %v3049_v2  ;;  %2506 = vmatpush3.bf16.msra.mxu1 %v2892_v6  ;;  %v2899_v13 = vld [vmem:[%s3701_s2 + $0x60] sm:$0xff]   ;;  %v2902_v16 = vld [vmem:[%s3701_s2 + $0x28] sm:$0xff]   ;;  %v2903_v17 = vld [vmem:[%s3701_s2 + $0x70] sm:$0xff]  }
   0x6   :  { %2507 = vmatprep.subr.bf16.mxu1 %v2893_v7  ;;  %v2900_v14 = vld [vmem:[%s3701_s2 + $0x20] sm:$0xff]   ;;  %v2904_v18 = vld [vmem:[%s3701_s2 + $0x30] sm:$0xff]   ;;  %v2905_v19 = vld [vmem:[%s3701_s2 + $0x78] sm:$0xff]  }
   0x7   :  { %2712 = vmatmul.mubr.msk.bf16.vlgmr.msra.gmra.mrb[0].mxu0 %vm35_vm1, %v3099_v4  ;;  %v2906_v20 = vld [vmem:[%s3701_s2 + $0x38] sm:$0xff]  }
   0x8   :  { %2717 = vmatprep.mubr.msk.bf16.mxu0 %vm3050_vm0, %v3049_v2 }
   0x9   :  { %2508 = vmatpush3.bf16.msra.mxu1 %v2894_v8 }
   0xa   :  { %2509 = vmatprep.subr.bf16.mxu1 %v2895_v9 }
   0xd   :  { %2510 = vmatpush3.bf16.msra.mxu1 %v2896_v10 }
   0xe   :  { %2511 = vmatprep.subr.bf16.mxu1 %v2897_v11 }
  0x11   :  { %2512 = vmatpush3.bf16.msra.mxu1 %v2898_v12 }
  0x12   :  { %2513 = vmatprep.subr.bf16.mxu1 %v2899_v13 }
  0x15   :  { %2514 = vmatpush3.bf16.msra.mxu1 %v2900_v14 }
  0x16   :  { %2515 = vmatprep.subr.bf16.mxu1 %v2901_v15 }
  0x19   :  { %2516 = vmatpush3.bf16.msra.mxu1 %v2902_v16 }
  0x1a   :  { %2517 = vmatprep.subr.bf16.mxu1 %v2903_v17 }
  0x1d   :  { %2518 = vmatpush3.bf16.msra.mxu1 %v2904_v18 }
  0x1e   :  { %2519 = vmatprep.subr.bf16.mxu1 %v2905_v19 }
  0x21   :  { %2520 = vmatpush3.bf16.msra.mxu1 %v2906_v20 }
  0x22   :  { %2721 = vmatprep.subr.bf16.mxu1 %v3049_v2 }
  0x23   :  { %11 = vsyncpa [#allocation3], 0  ;;  %v2139_v27 = vld [vmem:[%s3703_s4] ss:$0 sm:$0xff]  ;;  %v3166_v39 = vld [vmem:[%s3700_s1 + $0x8] sm:$0xff]   ;;  %vm2105_vm2 = vcmask 1041409  }
  0x24   :  { %v2908_v37 = vld [vmem:[%s3701_s2 + $0xc0] sm:$0xff]   ;;  %v2910_v41 = vld [vmem:[%s3701_s2 + $0xc8] sm:$0xff]   ;;  %v2912_v43 = vld [vmem:[%s3701_s2 + $0xd0] sm:$0xff]   ;;  %vm2109_vm4 = vcmask 1041408  }
  0x25   :  { %v2909_v40 = vld [vmem:[%s3701_s2 + $0x80] sm:$0xff]   ;;  %v2911_v42 = vld [vmem:[%s3701_s2 + $0x88] sm:$0xff]   ;;  %v2913_v44 = vld [vmem:[%s3701_s2 + $0x90] sm:$0xff]  }
  0x26   :  { %v2914_v45 = vld [vmem:[%s3701_s2 + $0xd8] sm:$0xff]   ;;  %v2916_v47 = vld [vmem:[%s3701_s2 + $0xe0] sm:$0xff]   ;;  %v2918_v49 = vld [vmem:[%s3701_s2 + $0xe8] sm:$0xff]  }
  0x27   :  { %v2915_v46 = vld [vmem:[%s3701_s2 + $0x98] sm:$0xff]   ;;  %v2917_v48 = vld [vmem:[%s3701_s2 + $0xa0] sm:$0xff]   ;;  %v2919_v50 = vld [vmem:[%s3701_s2 + $0xa8] sm:$0xff]  }
  0x28   :  { %v2920_v51 = vld [vmem:[%s3701_s2 + $0xf0] sm:$0xff]   ;;  %v2922_v53 = vld [vmem:[%s3701_s2 + $0xf8] sm:$0xff]   ;;  %v2192_v61 = vld [vmem:[%s3703_s4 + $0x1] ss:$0 sm:$0xff] }
  0x29   :  { %v2921_v52 = vld [vmem:[%s3701_s2 + $0xb0] sm:$0xff]   ;;  %v2923_v54 = vld [vmem:[%s3701_s2 + $0xb8] sm:$0xff]   ;;  %v3224_v9 = vld [vmem:[%s3701_s2 + $0x140] sm:$0xff]  }
  0x2a   :  { %v3229_v11 = vld [vmem:[%s3700_s1 + $0x10] sm:$0xff]   ;;  %v3234_v12 = vld [vmem:[%s3701_s2 + $0x100] sm:$0xff]   ;;  %v3240_v13 = vld [vmem:[%s3701_s2 + $0x148] sm:$0xff]  }
  0x2b   :  { %v3248_v14 = vld [vmem:[%s3701_s2 + $0x108] sm:$0xff]   ;;  %v3254_v15 = vld [vmem:[%s3701_s2 + $0x150] sm:$0xff]   ;;  %v3266_v17 = vld [vmem:[%s3701_s2 + $0x158] sm:$0xff]  }
  0x2c   :  { %v3260_v16 = vld [vmem:[%s3701_s2 + $0x110] sm:$0xff]   ;;  %v3272_v18 = vld [vmem:[%s3701_s2 + $0x118] sm:$0xff]   ;;  %v3278_v19 = vld [vmem:[%s3701_s2 + $0x160] sm:$0xff]  }
  0x2d   :  { %v3284_v20 = vld [vmem:[%s3701_s2 + $0x120] sm:$0xff]  }
  0xda   :  { %v73_v21 = vpop.f32.mrb[0].mxu0 }
  0xdb   :  { %v2713_v22 = vpop.f32.mrb[1].mxu0 }
  0xdc   :  { %v76_v23 = vpop.f32.mrb[2].mxu0  ;;  %v3296_v22 = vld [vmem:[%s3701_s2 + $0x128] sm:$0xff]  }
  0xdd   :  { %v2714_v24 = vpop.f32.mrb[3].mxu0  ;;  %v80_v25 = vpack.c.bf16 %v76_v23, %v73_v21  ;;  %v3290_v21 = vld [vmem:[%s3701_s2 + $0x168] sm:$0xff]   ;;  %v3302_v23 = vld [vmem:[%s3701_s2 + $0x170] sm:$0xff]  }
  0xde   :  { %v3308_v24 = vld [vmem:[%s3701_s2 + $0x130] sm:$0xff]  }
  0xdf   :  { %246 = vmatprep.mubr.bf16.mxu1 %v80_v25  ;;  %v2939_v25 = vld [vmem:[%s3701_s2 + $0x178] sm:$0xff]  }
  0xe0   :  { %247 = vmatmul.mubr.bf16.vlgmr.msra.gmra.mrb[0].mxu1 %v27_v3 }
  0xe1   :  { %2723 = vmatprep.mubr.msk.bf16.mxu1 %vm3050_vm0, %v3049_v2 }
 0x1b3   :  { %v2521_v26 = vpop.f32.mrb[0].mxu1 }
 0x1b4   :  { %v2522_v28 = vpop.f32.mrb[1].mxu1 }
 0x1b5   :  { %v2523_v29 = vadd.f32 %v2522_v28, %v2521_v26  ;;  %v2524_v30 = vpop.f32.mrb[2].mxu1  ;;  %v2940_v26 = vld [vmem:[%s3701_s2 + $0x138] sm:$0xff]   ;;  %v2942_v28 = vld [vmem:[%s3702_s3 + $0x8] sm:$0xff]  }
 0x1b6   :  { %v2525_v31 = vpop.f32.mrb[3].mxu1 }
 0x1b7   :  { %v249_v32 = vadd.f32 %v2523_v29, %v2139_v27  ;;  %v2526_v33 = vadd.f32 %v2525_v31, %v2524_v30  ;;  %v2943_v29 = vld [vmem:[%s3702_s3 + $0x10] sm:$0xff]   ;;  %v2944_v30 = vld [vmem:[%s3702_s3 + $0x18] sm:$0xff]   ;;  %v2945_v31 = vld [vmem:[%s3702_s3 + $0x20] sm:$0xff]  }
 0x1b9   :  { %v252_v34 = vadd.f32 %v2526_v33, %v2139_v27  ;;  %v255_v35 = vmax.f32 %v249_v32, 0.0  ;;  %v2941_v27 = vld [vmem:[%s3702_s3] sm:$0xff]  }
 0x1bb   :  { %v256_v36 = vmax.f32 %v252_v34, 0.0 }
 0x1bd   :  { %v257_v38 = vpack.c.bf16 %v256_v36, %v255_v35 }
 0x1bf   :  { %2716 = vmatpush3.bf16.msra.mxu0 %v257_v38 }
 0x1c0   :  { %2529 = vmatprep.subr.bf16.mxu0 %v2908_v37  ;;  %v2946_v37 = vld [vmem:[%s3702_s3 + $0x28] sm:$0xff]  }
 0x1c2   :  { %2718 = vmatmul.mubr.msk.bf16.vlgmr.msra.gmra.mrb[4].mxu0 %vm35_vm1, %v3166_v39 }
 0x1c3   :  { %2530 = vmatpush3.bf16.msra.mxu0 %v2909_v40  ;;  %v2948_v40 = vld [vmem:[%s3702_s3 + $0x38] sm:$0xff]  }
 0x1c4   :  { %2531 = vmatprep.subr.bf16.mxu0 %v2910_v41 }
 0x1c7   :  { %2532 = vmatpush3.bf16.msra.mxu0 %v2911_v42  ;;  %v2245_v42 = vld [vmem:[%s3703_s4 + $0x2] ss:$0 sm:$0xff] }
 0x1c8   :  { %2533 = vmatprep.subr.bf16.mxu0 %v2912_v43 }
 0x1cb   :  { %2534 = vmatpush3.bf16.msra.mxu0 %v2913_v44 }
 0x1cc   :  { %2535 = vmatprep.subr.bf16.mxu0 %v2914_v45 }
 0x1cf   :  { %2536 = vmatpush3.bf16.msra.mxu0 %v2915_v46 }
 0x1d0   :  { %2537 = vmatprep.subr.bf16.mxu0 %v2916_v47 }
 0x1d3   :  { %2538 = vmatpush3.bf16.msra.mxu0 %v2917_v48 }
 0x1d4   :  { %2539 = vmatprep.subr.bf16.mxu0 %v2918_v49 }
 0x1d7   :  { %2540 = vmatpush3.bf16.msra.mxu0 %v2919_v50 }
 0x1d8   :  { %2541 = vmatprep.subr.bf16.mxu0 %v2920_v51 }
 0x1db   :  { %2542 = vmatpush3.bf16.msra.mxu0 %v2921_v52 }
 0x1dc   :  { %2543 = vmatprep.subr.bf16.mxu0 %v2922_v53  ;;  %v2262_v53 = vld [vmem:[%s3703_s4 + $0x5] ss:$0 sm:$0xff] }
 0x1df   :  { %2544 = vmatpush3.bf16.msra.mxu0 %v2923_v54 }
 0x1e0   :  { %2727 = vmatprep.subr.bf16.mxu0 %v3049_v2 }
 0x295   :  { %v303_v55 = vpop.f32.mrb[4].mxu0 }
 0x296   :  { %v2719_v56 = vpop.f32.mrb[5].mxu0 }
 0x297   :  { %v306_v57 = vpop.f32.mrb[6].mxu0 }
 0x298   :  { %v310_v58 = vpack.c.bf16 %v306_v57, %v303_v55  ;;  %v2720_v59 = vpop.f32.mrb[7].mxu0 }
 0x29a   :  { %477 = vmatprep.mubr.bf16.mxu0 %v310_v58 }
 0x29b   :  { %478 = vmatmul.mubr.bf16.vlgmr.msra.gmra.mrb[8].mxu0 %v257_v38  ;;  %v2947_v38 = vld [vmem:[%s3702_s3 + $0x30] sm:$0xff]  }
 0x29c   :  { %2743 = vmatprep.mubr.msk.bf16.mxu0 %vm3050_vm0, %v3049_v2  ;;  %2728 = vmatpush3.bf16.msra.mxu0 %v2941_v27  ;;  %v2960_v27 = vld [vmem:[%s3701_s2 + $0x1a8] sm:$0xff]  }
 0x29d   :  { %2729 = vmatprep.subr.bf16.mxu0 %v3049_v2 }
 0x2a0   :  { %2730 = vmatpush3.bf16.msra.mxu0 %v2942_v28  ;;  %v2961_v28 = vld [vmem:[%s3701_s2 + $0x1f0] sm:$0xff]  }
 0x2a1   :  { %2731 = vmatprep.subr.bf16.mxu0 %v3049_v2 }
 0x2a4   :  { %2732 = vmatpush3.bf16.msra.mxu0 %v2943_v29  ;;  %v2962_v29 = vld [vmem:[%s3701_s2 + $0x1b0] sm:$0xff]  }
 0x2a5   :  { %2733 = vmatprep.subr.bf16.mxu0 %v3049_v2 }
 0x2a8   :  { %2734 = vmatpush3.bf16.msra.mxu0 %v2944_v30  ;;  %v2963_v30 = vld [vmem:[%s3701_s2 + $0x1f8] sm:$0xff]  }
 0x2a9   :  { %2735 = vmatprep.subr.bf16.mxu0 %v3049_v2 }
 0x2ac   :  { %2736 = vmatpush3.bf16.msra.mxu0 %v2945_v31  ;;  %v2964_v31 = vld [vmem:[%s3701_s2 + $0x1b8] sm:$0xff]  }
 0x2ad   :  { %2737 = vmatprep.subr.bf16.mxu0 %v3049_v2 }
 0x2b0   :  { %2738 = vmatpush3.bf16.msra.mxu0 %v2946_v37 }
 0x2b1   :  { %2739 = vmatprep.subr.bf16.mxu0 %v3049_v2 }
 0x2b4   :  { %2740 = vmatpush3.bf16.msra.mxu0 %v2947_v38  ;;  %v2305_v38 = vld [vmem:[%s3703_s4 + $0x3] ss:$0 sm:$0xff] }
 0x2b5   :  { %2741 = vmatprep.subr.bf16.mxu0 %v3049_v2 }
 0x2b8   :  { %2742 = vmatpush3.bf16.msra.mxu0 %v2948_v40 }
 0x2b9   :  { %2586 = vmatprep.subr.bf16.mxu0 %v3224_v9 }
 0x36e   :  { %v2545_v60 = vpop.f32.mrb[8].mxu0 }
 0x36f   :  { %v2546_v62 = vpop.f32.mrb[9].mxu0 }
 0x370   :  { %v2547_v63 = vadd.f32 %v2546_v62, %v2545_v60  ;;  %v2548_v0 = vpop.f32.mrb[10].mxu0 }
 0x371   :  { %v2549_v1 = vpop.f32.mrb[11].mxu0 }
 0x372   :  { %v480_v3 = vadd.f32 %v2547_v63, %v2192_v61  ;;  %v2550_v5 = vadd.f32 %v2549_v1, %v2548_v0 }
 0x374   :  { %v483_v6 = vadd.f32 %v2550_v5, %v2192_v61  ;;  %v486_v7 = vmax.f32 %v480_v3, 0.0 }
 0x376   :  { %v487_v8 = vmax.f32 %v483_v6, 0.0 }
 0x378   :  { %v488_v10 = vpack.c.bf16 %v487_v8, %v486_v7 }
 0x37a   :  { %2722 = vmatpush3.bf16.msra.mxu1 %v488_v10 }
 0x37b   :  { %2553 = vmatprep.subr.bf16.mxu1 %v3224_v9 }
 0x37d   :  { %2724 = vmatmul.mubr.msk.bf16.vlgmr.msra.gmra.mrb[4].mxu1 %vm35_vm1, %v3229_v11 }
 0x37e   :  { %2554 = vmatpush3.bf16.msra.mxu1 %v3234_v12 }
 0x37f   :  { %2555 = vmatprep.subr.bf16.mxu1 %v3240_v13 }
 0x382   :  { %2556 = vmatpush3.bf16.msra.mxu1 %v3248_v14 }
 0x383   :  { %2557 = vmatprep.subr.bf16.mxu1 %v3254_v15 }
 0x386   :  { %2558 = vmatpush3.bf16.msra.mxu1 %v3260_v16 }
 0x387   :  { %2559 = vmatprep.subr.bf16.mxu1 %v3266_v17 }
 0x38a   :  { %2560 = vmatpush3.bf16.msra.mxu1 %v3272_v18 }
 0x38b   :  { %2561 = vmatprep.subr.bf16.mxu1 %v3278_v19 }
 0x38e   :  { %2562 = vmatpush3.bf16.msra.mxu1 %v3284_v20 }
 0x38f   :  { %2563 = vmatprep.subr.bf16.mxu1 %v3290_v21 }
 0x392   :  { %2564 = vmatpush3.bf16.msra.mxu1 %v3296_v22 }
 0x393   :  { %2565 = vmatprep.subr.bf16.mxu1 %v3302_v23 }
 0x396   :  { %2566 = vmatpush3.bf16.msra.mxu1 %v3308_v24 }
 0x397   :  { %2567 = vmatprep.subr.bf16.mxu1 %v2939_v25 }
 0x39a   :  { %2568 = vmatpush3.bf16.msra.mxu1 %v2940_v26 }
 0x39b   :  { %2747 = vmatprep.subr.bf16.mxu1 %v3049_v2 }
 0x450   :  { %v534_v32 = vpop.f32.mrb[4].mxu1 }
 0x451   :  { %v2725_v33 = vpop.f32.mrb[5].mxu1 }
 0x452   :  { %v537_v34 = vpop.f32.mrb[6].mxu1 }
 0x453   :  { %v541_v35 = vpack.c.bf16 %v537_v34, %v534_v32  ;;  %v2726_v36 = vpop.f32.mrb[7].mxu1 }
 0x455   :  { %708 = vmatprep.mubr.bf16.mxu1 %v541_v35 }
 0x456   :  { %709 = vmatmul.mubr.bf16.vlgmr.msra.gmra.mrb[8].mxu1 %v488_v10 }
 0x457   :  { %2749 = vmatprep.mubr.msk.bf16.mxu1 %vm3050_vm0, %v3049_v2 }
 0x529   :  { %v2569_v41 = vpop.f32.mrb[8].mxu1 }
 0x52a   :  { %v2570_v43 = vpop.f32.mrb[9].mxu1 }
 0x52b   :  { %v2571_v44 = vadd.f32 %v2570_v43, %v2569_v41  ;;  %v2572_v45 = vpop.f32.mrb[10].mxu1 }
 0x52c   :  { %v2573_v46 = vpop.f32.mrb[11].mxu1 }
 0x52d   :  { %v711_v47 = vadd.f32 %v2571_v44, %v2245_v42  ;;  %v2574_v48 = vadd.f32 %v2573_v46, %v2572_v45 }
 0x52f   :  { %v714_v49 = vadd.f32 %v2574_v48, %v2245_v42  ;;  %v717_v50 = vmax.f32 %v711_v47, 0.0 }
 0x531   :  { %v718_v51 = vmax.f32 %v714_v49, 0.0  ;;  %v2965_v49 = vld [vmem:[%s3701_s2 + $0x240] sm:$0xff]  }
 0x533   :  { %v719_v52 = vpack.c.bf16 %v718_v51, %v717_v50  ;;  %v2966_v51 = vld [vmem:[%s3701_s2 + $0x200] sm:$0xff]  }
 0x535   :  { %2744 = vmatmul.mubr.bf16.vlgmr.msra.gmra.mrb[12].mxu0 %v719_v52  ;;  %v2967_v52 = vld [vmem:[%s3701_s2 + $0x248] sm:$0xff]  }
 0x536   :  { %2587 = vmatpush3.bf16.msra.mxu0 %v3234_v12 }
 0x537   :  { %2588 = vmatprep.subr.bf16.mxu0 %v3240_v13 }
 0x53a   :  { %2589 = vmatpush3.bf16.msra.mxu0 %v3248_v14 }
 0x53b   :  { %2590 = vmatprep.subr.bf16.mxu0 %v3254_v15 }
 0x53e   :  { %2591 = vmatpush3.bf16.msra.mxu0 %v3260_v16  ;;  %v2949_v16 = vld [vmem:[%s3701_s2 + $0x1c0] sm:$0xff]  }
 0x53f   :  { %2592 = vmatprep.subr.bf16.mxu0 %v3266_v17 }
 0x542   :  { %2593 = vmatpush3.bf16.msra.mxu0 %v3272_v18  ;;  %v2950_v18 = vld [vmem:[%s3701_s2 + $0x180] sm:$0xff]  }
 0x543   :  { %2594 = vmatprep.subr.bf16.mxu0 %v3278_v19  ;;  %v2951_v19 = vld [vmem:[%s3701_s2 + $0x1c8] sm:$0xff]  }
 0x546   :  { %2595 = vmatpush3.bf16.msra.mxu0 %v3284_v20  ;;  %v2952_v20 = vld [vmem:[%s3701_s2 + $0x188] sm:$0xff]  }
 0x547   :  { %2596 = vmatprep.subr.bf16.mxu0 %v3290_v21  ;;  %v2953_v21 = vld [vmem:[%s3701_s2 + $0x1d0] sm:$0xff]  }
 0x54a   :  { %2597 = vmatpush3.bf16.msra.mxu0 %v3296_v22  ;;  %v2954_v22 = vld [vmem:[%s3701_s2 + $0x190] sm:$0xff]  }
 0x54b   :  { %2598 = vmatprep.subr.bf16.mxu0 %v3302_v23  ;;  %v2956_v23 = vld [vmem:[%s3701_s2 + $0x198] sm:$0xff]  }
 0x54e   :  { %2599 = vmatpush3.bf16.msra.mxu0 %v3308_v24  ;;  %v2957_v24 = vld [vmem:[%s3701_s2 + $0x1e0] sm:$0xff]  }
 0x54f   :  { %2600 = vmatprep.subr.bf16.mxu0 %v2939_v25  ;;  %v2958_v25 = vld [vmem:[%s3701_s2 + $0x1a0] sm:$0xff]  }
 0x552   :  { %2601 = vmatpush3.bf16.msra.mxu0 %v2940_v26  ;;  %v2959_v26 = vld [vmem:[%s3701_s2 + $0x1e8] sm:$0xff]  }
 0x553   :  { %2759 = vmatprep.subr.bf16.mxu0 %v3049_v2 }
 0x608   :  { %v823_v54 = vpop.f32.mrb[12].mxu0 }
 0x609   :  { %v824_v55 = vadd.f32 %v2262_v53, %v823_v54  ;;  %v2745_v56 = vpop.f32.mrb[13].mxu0  ;;  %v2969_v54 = vld [vmem:[%s3701_s2 + $0x250] sm:$0xff]  }
 0x60a   :  { %v826_v57 = vpop.f32.mrb[14].mxu0  ;;  %v2972_v56 = vld [vmem:[%s3701_s2 + $0x218] sm:$0xff]  }
 0x60b   :  { %v827_v58 = vadd.f32 %v2262_v53, %v826_v57  ;;  %v2746_v59 = vpop.f32.mrb[15].mxu0  ;;  %v830_v60 = vmax.f32 %v824_v55, 0.0  ;;  %v2968_v53 = vld [vmem:[%s3701_s2 + $0x208] sm:$0xff]   ;;  %v2970_v55 = vld [vmem:[%s3701_s2 + $0x210] sm:$0xff]   ;;  %v2973_v57 = vld [vmem:[%s3701_s2 + $0x260] sm:$0xff]  }
 0x60c   :  { %v2975_v59 = vld [vmem:[%s3701_s2 + $0x268] sm:$0xff]  }
 0x60d   :  { %v831_v61 = vmax.f32 %v827_v58, 0.0  ;;  %v2974_v58 = vld [vmem:[%s3701_s2 + $0x220] sm:$0xff]  }
 0x60f   :  { %v832_v62 = vpack.c.bf16 %v831_v61, %v830_v60  ;;  %v2976_v60 = vld [vmem:[%s3701_s2 + $0x228] sm:$0xff]   ;;  %v2977_v61 = vld [vmem:[%s3701_s2 + $0x270] sm:$0xff]  }
 0x611   :  { %2748 = vmatpush3.bf16.msra.mxu1 %v832_v62 }
 0x612   :  { %2753 = vmatprep.subr.bf16.mxu1 %v3049_v2 }
 0x614   :  { %2750 = vmatmul.mubr.msk.bf16.vlgmr.msra.gmra.mrb[12].mxu1 %vm35_vm1, %v3099_v4 }
 0x615   :  { %2755 = vmatprep.mubr.msk.bf16.mxu1 %vm3050_vm0, %v3049_v2 }
 0x6e7   :  { %v867_v63 = vpop.f32.mrb[12].mxu1 }
 0x6e8   :  { %v2751_v0 = vpop.f32.mrb[13].mxu1 }
 0x6e9   :  { %v870_v1 = vpop.f32.mrb[14].mxu1  ;;  %v2980_v0 = vld [vmem:[%s3701_s2 + $0x238] sm:$0xff]  }
 0x6ea   :  { %v874_v3 = vpack.c.bf16 %v870_v1, %v867_v63  ;;  %v2752_v5 = vpop.f32.mrb[15].mxu1  ;;  %v2979_v63 = vld [vmem:[%s3701_s2 + $0x278] sm:$0xff]   ;;  %v2981_v1 = vld [vmem:[%s3702_s3 + $0x40] sm:$0xff]  }
 0x6eb   :  { %v2983_v5 = vld [vmem:[%s3702_s3 + $0x50] sm:$0xff]  }
 0x6ec   :  { %907 = vmatprep.mubr.bf16.mxu0 %v874_v3  ;;  %v2982_v3 = vld [vmem:[%s3702_s3 + $0x48] sm:$0xff]  }
 0x6ed   :  { %908 = vmatmul.mubr.bf16.vlgmr.msra.gmra.mrb[16].mxu0 %v832_v62  ;;  %v2978_v62 = vld [vmem:[%s3701_s2 + $0x230] sm:$0xff]  }
 0x6ee   :  { %2761 = vmatprep.mubr.msk.bf16.mxu0 %vm3050_vm0, %v3049_v2 }
 0x7c0   :  { %v2602_v6 = vpop.f32.mrb[16].mxu0 }
 0x7c1   :  { %v2603_v7 = vpop.f32.mrb[17].mxu0 }
 0x7c2   :  { %v2604_v8 = vadd.f32 %v2603_v7, %v2602_v6  ;;  %v2605_v9 = vpop.f32.mrb[18].mxu0  ;;  %v2984_v6 = vld [vmem:[%s3702_s3 + $0x58] sm:$0xff]   ;;  %v2985_v7 = vld [vmem:[%s3702_s3 + $0x60] sm:$0xff]  }
 0x7c3   :  { %v2606_v10 = vpop.f32.mrb[19].mxu0 }
 0x7c4   :  { %v910_v12 = vadd.f32 %v2604_v8, %v2245_v42  ;;  %v2607_v4 = vadd.f32 %v2606_v10, %v2605_v9 }
 0x7c6   :  { %v913_v13 = vadd.f32 %v2607_v4, %v2245_v42  ;;  %v916_v14 = vmax.f32 %v910_v12, 0.0 }
 0x7c8   :  { %v917_v15 = vmax.f32 %v913_v13, 0.0  ;;  %v2986_v13 = vld [vmem:[%s3702_s3 + $0x68] sm:$0xff]  }
 0x7ca   :  { %v918_v17 = vpack.c.bf16 %v917_v15, %v916_v14  ;;  %v2987_v14 = vld [vmem:[%s3702_s3 + $0x70] sm:$0xff]   ;;  %v2988_v15 = vld [vmem:[%s3702_s3 + $0x78] sm:$0xff]  }
 0x7cc   :  { %2754 = vmatpush3.bf16.msra.mxu1 %v918_v17 }
 0x7cd   :  { %2610 = vmatprep.subr.bf16.mxu1 %v2949_v16  ;;  %v2989_v16 = vld [vmem:[%s3702_s3 + $0x80] sm:$0xff]  }
 0x7cf   :  { %2756 = vmatmul.mubr.msk.bf16.vlgmr.msra.gmra.mrb[16].mxu1 %vm35_vm1, %v3166_v39  ;;  %v2955_v39 = vld [vmem:[%s3701_s2 + $0x1d8] sm:$0xff]  }
 0x7d0   :  { %2611 = vmatpush3.bf16.msra.mxu1 %v2950_v18  ;;  %v2991_v18 = vld [vmem:[%s3702_s3 + $0x90] sm:$0xff]  }
 0x7d1   :  { %2612 = vmatprep.subr.bf16.mxu1 %v2951_v19  ;;  %v2992_v19 = vld [vmem:[%s3702_s3 + $0x98] sm:$0xff]  }
 0x7d4   :  { %2613 = vmatpush3.bf16.msra.mxu1 %v2952_v20  ;;  %v2993_v20 = vld [vmem:[%s3702_s3 + $0xa0] sm:$0xff]  }
 0x7d5   :  { %2614 = vmatprep.subr.bf16.mxu1 %v2953_v21  ;;  %v2994_v21 = vld [vmem:[%s3702_s3 + $0xa8] sm:$0xff]  }
 0x7d8   :  { %2615 = vmatpush3.bf16.msra.mxu1 %v2954_v22 }
 0x7d9   :  { %2616 = vmatprep.subr.bf16.mxu1 %v2955_v39  ;;  %v2355_v39 = vld [vmem:[%s3703_s4 + $0x4] ss:$0 sm:$0xff] }
 0x7dc   :  { %2617 = vmatpush3.bf16.msra.mxu1 %v2956_v23 }
 0x7dd   :  { %2618 = vmatprep.subr.bf16.mxu1 %v2957_v24 }
 0x7e0   :  { %2619 = vmatpush3.bf16.msra.mxu1 %v2958_v25 }
 0x7e1   :  { %2620 = vmatprep.subr.bf16.mxu1 %v2959_v26 }
 0x7e4   :  { %2621 = vmatpush3.bf16.msra.mxu1 %v2960_v27 }
 0x7e5   :  { %2622 = vmatprep.subr.bf16.mxu1 %v2961_v28 }
 0x7e8   :  { %2623 = vmatpush3.bf16.msra.mxu1 %v2962_v29 }
 0x7e9   :  { %2624 = vmatprep.subr.bf16.mxu1 %v2963_v30 }
 0x7ec   :  { %2625 = vmatpush3.bf16.msra.mxu1 %v2964_v31 }
 0x7ed   :  { %2765 = vmatprep.subr.bf16.mxu1 %v3049_v2 }
 0x8a2   :  { %v953_v32 = vpop.f32.mrb[16].mxu1 }
 0x8a3   :  { %v2757_v33 = vpop.f32.mrb[17].mxu1 }
 0x8a4   :  { %v956_v34 = vpop.f32.mrb[18].mxu1  ;;  %v2995_v33 = vld [vmem:[%s3702_s3 + $0xb0] sm:$0xff]  }
 0x8a5   :  { %v960_v35 = vpack.c.bf16 %v956_v34, %v953_v32  ;;  %v2758_v36 = vpop.f32.mrb[19].mxu1  ;;  %v2996_v34 = vld [vmem:[%s3702_s3 + $0xb8] sm:$0xff]  }
 0x8a6   :  { %v2998_v36 = vld [vmem:[%s3702_s3 + $0xc8] sm:$0xff]  }
 0x8a7   :  { %1127 = vmatprep.mubr.bf16.mxu1 %v960_v35  ;;  %v2997_v35 = vld [vmem:[%s3702_s3 + $0xc0] sm:$0xff]  }
 0x8a8   :  { %1128 = vmatmul.mubr.bf16.vlgmr.msra.gmra.mrb[20].mxu1 %v918_v17  ;;  %v2990_v17 = vld [vmem:[%s3702_s3 + $0x88] sm:$0xff]  }
 0x8a9   :  { %2781 = vmatprep.mubr.msk.bf16.mxu1 %vm3050_vm0, %v3049_v2  ;;  %2766 = vmatpush3.bf16.msra.mxu1 %v2981_v1 }
 0x8aa   :  { %2767 = vmatprep.subr.bf16.mxu1 %v3049_v2 }
 0x8ad   :  { %2768 = vmatpush3.bf16.msra.mxu1 %v2982_v3  ;;  %v3006_v3 = vld [vmem:[%s3702_s3 + $0x140] sm:$0xff]  }
 0x8ae   :  { %2769 = vmatprep.subr.bf16.mxu1 %v3049_v2 }
 0x8b1   :  { %2770 = vmatpush3.bf16.msra.mxu1 %v2983_v5 }
 0x8b2   :  { %2771 = vmatprep.subr.bf16.mxu1 %v3049_v2 }
 0x8b5   :  { %2772 = vmatpush3.bf16.msra.mxu1 %v2984_v6  ;;  %v3008_v6 = vld [vmem:[%s3702_s3 + $0x148] sm:$0xff]  }
 0x8b6   :  { %2773 = vmatprep.subr.bf16.mxu1 %v3049_v2 }
 0x8b9   :  { %2774 = vmatpush3.bf16.msra.mxu1 %v2985_v7  ;;  %v3010_v7 = vld [vmem:[%s3702_s3 + $0x150] sm:$0xff]  }
 0x8ba   :  { %2775 = vmatprep.subr.bf16.mxu1 %v3049_v2 }
 0x8bd   :  { %2776 = vmatpush3.bf16.msra.mxu1 %v2986_v13  ;;  %v3019_v13 = vld [vmem:[%s3702_s3 + $0x138] sm:$0xff]  }
 0x8be   :  { %2777 = vmatprep.subr.bf16.mxu1 %v3049_v2 }
 0x8c1   :  { %2778 = vmatpush3.bf16.msra.mxu1 %v2987_v14  ;;  %v3020_v14 = vld [vmem:[%s3702_s3 + $0x178] sm:$0xff]  }
 0x8c2   :  { %2779 = vmatprep.subr.bf16.mxu1 %v3049_v2 }
 0x8c5   :  { %2780 = vmatpush3.bf16.msra.mxu1 %v2988_v15  ;;  %v2438_v15 = vld [vmem:[%s3703_s4 + $0x8] ss:$0 sm:$0xff] }
 0x8c6   :  { %2805 = vmatprep.subr.bf16.mxu1 %v3049_v2 }
 0x97b   :  { %v2626_v37 = vpop.f32.mrb[20].mxu1 }
 0x97c   :  { %v2627_v40 = vpop.f32.mrb[21].mxu1 }
 0x97d   :  { %v2628_v41 = vadd.f32 %v2627_v40, %v2626_v37  ;;  %v2629_v42 = vpop.f32.mrb[22].mxu1  ;;  %v2999_v37 = vld [vmem:[%s3702_s3 + $0xd0] sm:$0xff]   ;;  %v3001_v40 = vld [vmem:[%s3702_s3 + $0xe0] sm:$0xff]  }
 0x97e   :  { %v2630_v43 = vpop.f32.mrb[23].mxu1 }
 0x97f   :  { %v1130_v44 = vadd.f32 %v2628_v41, %v2305_v38  ;;  %v2631_v45 = vadd.f32 %v2630_v43, %v2629_v42  ;;  %v3002_v41 = vld [vmem:[%s3702_s3 + $0xe8] sm:$0xff]   ;;  %v2388_v42 = vld [vmem:[%s3703_s4 + $0x6] ss:$0 sm:$0xff] }
 0x981   :  { %v1133_v46 = vadd.f32 %v2631_v45, %v2305_v38  ;;  %v1136_v47 = vmax.f32 %v1130_v44, 0.0  ;;  %v3000_v38 = vld [vmem:[%s3702_s3 + $0xd8] sm:$0xff]  }
 0x983   :  { %v1137_v48 = vmax.f32 %v1133_v46, 0.0 }
 0x985   :  { %v1138_v50 = vpack.c.bf16 %v1137_v48, %v1136_v47 }
 0x987   :  { %2760 = vmatpush3.bf16.msra.mxu0 %v1138_v50 }
 0x988   :  { %2634 = vmatprep.subr.bf16.mxu0 %v2965_v49 }
 0x98a   :  { %2762 = vmatmul.mubr.msk.bf16.vlgmr.msra.gmra.mrb[20].mxu0 %vm35_vm1, %v3229_v11  ;;  %v2971_v11 = vld [vmem:[%s3701_s2 + $0x258] sm:$0xff]  }
 0x98b   :  { %2635 = vmatpush3.bf16.msra.mxu0 %v2966_v51 }
 0x98c   :  { %2636 = vmatprep.subr.bf16.mxu0 %v2967_v52  ;;  %v3003_v52 = vld [vmem:[%s3702_s3 + $0xf0] sm:$0xff]  }
 0x98f   :  { %2637 = vmatpush3.bf16.msra.mxu0 %v2968_v53  ;;  %v3004_v53 = vld [vmem:[%s3702_s3 + $0xf8] sm:$0xff]  }
 0x990   :  { %2638 = vmatprep.subr.bf16.mxu0 %v2969_v54  ;;  %v3005_v54 = vld [vmem:[%s3702_s3 + $0x100] sm:$0xff]  }
 0x993   :  { %2639 = vmatpush3.bf16.msra.mxu0 %v2970_v55  ;;  %v3007_v55 = vld [vmem:[%s3702_s3 + $0x108] sm:$0xff]  }
 0x994   :  { %2640 = vmatprep.subr.bf16.mxu0 %v2971_v11  ;;  %v3009_v11 = vld [vmem:[%s3702_s3 + $0x110] sm:$0xff]  }
 0x997   :  { %2641 = vmatpush3.bf16.msra.mxu0 %v2972_v56  ;;  %v3011_v56 = vld [vmem:[%s3702_s3 + $0x118] sm:$0xff]  }
 0x998   :  { %2642 = vmatprep.subr.bf16.mxu0 %v2973_v57  ;;  %v3013_v57 = vld [vmem:[%s3702_s3 + $0x120] sm:$0xff]  }
 0x99b   :  { %2643 = vmatpush3.bf16.msra.mxu0 %v2974_v58  ;;  %v3015_v58 = vld [vmem:[%s3702_s3 + $0x128] sm:$0xff]  }
 0x99c   :  { %2644 = vmatprep.subr.bf16.mxu0 %v2975_v59  ;;  %v2413_v59 = vld [vmem:[%s3703_s4 + $0x7] ss:$0 sm:$0xff] }
 0x99f   :  { %2645 = vmatpush3.bf16.msra.mxu0 %v2976_v60 }
 0x9a0   :  { %2646 = vmatprep.subr.bf16.mxu0 %v2977_v61 }
 0x9a3   :  { %2647 = vmatpush3.bf16.msra.mxu0 %v2978_v62 }
 0x9a4   :  { %2648 = vmatprep.subr.bf16.mxu0 %v2979_v63 }
 0x9a7   :  { %2649 = vmatpush3.bf16.msra.mxu0 %v2980_v0 }
 0x9a8   :  { %2785 = vmatprep.subr.bf16.mxu0 %v3049_v2 }
 0xa5d   :  { %v1173_v8 = vpop.f32.mrb[20].mxu0 }
 0xa5e   :  { %v2763_v9 = vpop.f32.mrb[21].mxu0 }
 0xa5f   :  { %v1176_v10 = vpop.f32.mrb[22].mxu0  ;;  %v3014_v9 = vld [vmem:[%s3702_s3 + $0x160] sm:$0xff]  }
 0xa60   :  { %v1180_v12 = vpack.c.bf16 %v1176_v10, %v1173_v8  ;;  %v2764_v4 = vpop.f32.mrb[23].mxu0  ;;  %v3012_v8 = vld [vmem:[%s3702_s3 + $0x158] sm:$0xff]   ;;  %v3016_v10 = vld [vmem:[%s3702_s3 + $0x168] sm:$0xff]  }
 0xa61   :  { %v3018_v4 = vld [vmem:[%s3702_s3 + $0x170] sm:$0xff]  }
 0xa62   :  { %1347 = vmatprep.mubr.bf16.mxu0 %v1180_v12  ;;  %v3017_v12 = vld [vmem:[%s3702_s3 + $0x130] sm:$0xff]  }
 0xa63   :  { %1348 = vmatmul.mubr.bf16.vlgmr.msra.gmra.mrb[24].mxu0 %v1138_v50 }
 0xa64   :  { %2801 = vmatprep.mubr.msk.bf16.mxu0 %vm3050_vm0, %v3049_v2  ;;  %2786 = vmatpush3.bf16.msra.mxu0 %v2989_v16 }
 0xa65   :  { %2787 = vmatprep.subr.bf16.mxu0 %v3049_v2 }
 0xa68   :  { %2788 = vmatpush3.bf16.msra.mxu0 %v2990_v17 }
 0xa69   :  { %2789 = vmatprep.subr.bf16.mxu0 %v3049_v2 }
 0xa6c   :  { %2790 = vmatpush3.bf16.msra.mxu0 %v2991_v18 }
 0xa6d   :  { %2791 = vmatprep.subr.bf16.mxu0 %v3049_v2 }
 0xa70   :  { %2792 = vmatpush3.bf16.msra.mxu0 %v2992_v19 }
 0xa71   :  { %2793 = vmatprep.subr.bf16.mxu0 %v3049_v2 }
 0xa74   :  { %2794 = vmatpush3.bf16.msra.mxu0 %v2993_v20 }
 0xa75   :  { %2795 = vmatprep.subr.bf16.mxu0 %v3049_v2 }
 0xa78   :  { %2796 = vmatpush3.bf16.msra.mxu0 %v2994_v21 }
 0xa79   :  { %2797 = vmatprep.subr.bf16.mxu0 %v3049_v2 }
 0xa7c   :  { %2798 = vmatpush3.bf16.msra.mxu0 %v2995_v33 }
 0xa7d   :  { %2799 = vmatprep.subr.bf16.mxu0 %v3049_v2 }
 0xa80   :  { %2800 = vmatpush3.bf16.msra.mxu0 %v2996_v34 }
 0xa81   :  { %2825 = vmatprep.subr.bf16.mxu0 %v3049_v2 }
 0xb36   :  { %v2650_v22 = vpop.f32.mrb[24].mxu0 }
 0xb37   :  { %v2651_v23 = vpop.f32.mrb[25].mxu0 }
 0xb38   :  { %v2652_v24 = vadd.f32 %v2651_v23, %v2650_v22  ;;  %v2653_v25 = vpop.f32.mrb[26].mxu0  ;;  %v1919_v22 = vld [vmem:[%s3704_s5] sm:$0xff] }
 0xb39   :  { %v2654_v26 = vpop.f32.mrb[27].mxu0 }
 0xb3a   :  { %v1350_v27 = vadd.f32 %v2652_v24, %v2355_v39  ;;  %v2655_v28 = vadd.f32 %v2654_v26, %v2653_v25  ;;  %v2488_v24 = vld [vmem:[%s3703_s4 + $0xa] ss:$0 sm:$0xff] }
 0xb3c   :  { %v1353_v29 = vadd.f32 %v2655_v28, %v2355_v39  ;;  %v1356_v30 = vmax.f32 %v1350_v27, 0.0  ;;  %v2463_v39 = vld [vmem:[%s3703_s4 + $0x9] ss:$0 sm:$0xff] }
 0xb3e   :  { %v1357_v31 = vmax.f32 %v1353_v29, 0.0 }
 0xb40   :  { %v1358_v32 = vpack.c.bf16 %v1357_v31, %v1356_v30 }
 0xb42   :  { %2782 = vmatmul.mubr.bf16.vlgmr.msra.gmra.mrb[24].mxu1 %v1358_v32 }
 0xb43   :  { %2821 = vmatprep.mubr.msk.bf16.mxu1 %vm3050_vm0, %v3049_v2  ;;  %2806 = vmatpush3.bf16.msra.mxu1 %v2997_v35 }
 0xb44   :  { %2807 = vmatprep.subr.bf16.mxu1 %v3049_v2 }
 0xb47   :  { %2808 = vmatpush3.bf16.msra.mxu1 %v2998_v36 }
 0xb48   :  { %2809 = vmatprep.subr.bf16.mxu1 %v3049_v2 }
 0xb4b   :  { %2810 = vmatpush3.bf16.msra.mxu1 %v2999_v37 }
 0xb4c   :  { %2811 = vmatprep.subr.bf16.mxu1 %v3049_v2 }
 0xb4f   :  { %2812 = vmatpush3.bf16.msra.mxu1 %v3000_v38  ;;  %v1920_v38 = vld [vmem:[%s3704_s5 + $0x8] sm:$0xff] }
 0xb50   :  { %2813 = vmatprep.subr.bf16.mxu1 %v3049_v2 }
 0xb53   :  { %2814 = vmatpush3.bf16.msra.mxu1 %v3001_v40  ;;  %v2499_v40 = vld [vmem:[%s3704_s5 + $0x10] sm:$0xff] }
 0xb54   :  { %2815 = vmatprep.subr.bf16.mxu1 %v3049_v2 }
 0xb57   :  { %2816 = vmatpush3.bf16.msra.mxu1 %v3002_v41  ;;  %v2500_v41 = vld [vmem:[%s3704_s5 + $0x18] sm:$0xff]  ;;  %s3051_s5 = smov [#allocation2]  }
 0xb58   :  { %2817 = vmatprep.subr.bf16.mxu1 %v3049_v2  ;;  %s2129_s28 = sshll.u32 %s3051_s5, 4  ;;  %s2130_s28 = int_to_ptr.vmem [resolvable:$true] %s2129_s28 }
 0xb59   :  { %s3025_s0 = scalar_lea.vmem %s2130_s28, 32  ;;  %p3030_p1 = scmp.lt.s32.totalorder %s2130_s28, %s2130_s28 }
 0xb5a   :  { %p3026_p0 = scmp.ne.s32.totalorder %s2130_s28, %s3025_s0  ;;  %p3031_p2 = scmp.lt.s32.totalorder %s3025_s0, %s3025_s0 }
 0xb5b   :  { %2818 = vmatpush3.bf16.msra.mxu1 %v3003_v52  ;;  %v2100_v52 = vlaneseq }
 0xb5c   :  { %2819 = vmatprep.subr.bf16.mxu1 %v3049_v2  ;;  %p3032_p3 = por %p3031_p2, %p3030_p1 }
 0xb5e   :  { %p3033_p4 = pnand %p3032_p3, %p3026_p0 }
 0xb5f   :  { %2820 = vmatpush3.bf16.msra.mxu1 %v3004_v53 }
 0xb60   :  { %2845 = vmatprep.subr.bf16.mxu1 %v3049_v2 }
 0xc15   :  { %v1463_v43 = vpop.f32.mrb[24].mxu1 }
 0xc16   :  { %v1464_v44 = vadd.f32 %v2388_v42, %v1463_v43  ;;  %v2783_v45 = vpop.f32.mrb[25].mxu1 }
 0xc17   :  { %v1466_v46 = vpop.f32.mrb[26].mxu1 }
 0xc18   :  { %v1467_v47 = vadd.f32 %v2388_v42, %v1466_v46  ;;  %v2784_v48 = vpop.f32.mrb[27].mxu1  ;;  %v1470_v49 = vmax.f32 %v1464_v44, 0.0 }
 0xc1a   :  { %v1471_v50 = vmax.f32 %v1467_v47, 0.0 }
 0xc1c   :  { %v1472_v51 = vpack.c.bf16 %v1471_v50, %v1470_v49 }
 0xc1e   :  { %2802 = vmatmul.mubr.bf16.vlgmr.msra.gmra.mrb[28].mxu0 %v1472_v51 }
 0xc1f   :  { %2841 = vmatprep.mubr.msk.bf16.mxu0 %vm3050_vm0, %v3049_v2  ;;  %2826 = vmatpush3.bf16.msra.mxu0 %v3005_v54 }
 0xc20   :  { %2827 = vmatprep.subr.bf16.mxu0 %v3049_v2 }
 0xc23   :  { %2828 = vmatpush3.bf16.msra.mxu0 %v3007_v55 }
 0xc24   :  { %2829 = vmatprep.subr.bf16.mxu0 %v3049_v2 }
 0xc27   :  { %2830 = vmatpush3.bf16.msra.mxu0 %v3009_v11 }
 0xc28   :  { %2831 = vmatprep.subr.bf16.mxu0 %v3049_v2 }
 0xc2b   :  { %2832 = vmatpush3.bf16.msra.mxu0 %v3011_v56  ;;  %v2101_v56 = vand.u32 127, %v2100_v52 }
 0xc2c   :  { %2833 = vmatprep.subr.bf16.mxu0 %v3049_v2 }
 0xc2d   :  { %vm2102_vm3 = vcmp.lt.s32.totalorder %v2101_v56, 8 }
 0xc2f   :  { %2834 = vmatpush3.bf16.msra.mxu0 %v3013_v57 }
 0xc30   :  { %2835 = vmatprep.subr.bf16.mxu0 %v3049_v2 }
 0xc33   :  { %2836 = vmatpush3.bf16.msra.mxu0 %v3015_v58 }
 0xc34   :  { %2837 = vmatprep.subr.bf16.mxu0 %v3049_v2 }
 0xc37   :  { %2838 = vmatpush3.bf16.msra.mxu0 %v3017_v12 }
 0xc38   :  { %2839 = vmatprep.subr.bf16.mxu0 %v3049_v2 }
 0xc3b   :  { %2840 = vmatpush3.bf16.msra.mxu0 %v3019_v13 }
 0xcf1   :  { %v1577_v60 = vpop.f32.mrb[28].mxu0 }
 0xcf2   :  { %v2803_v61 = vpop.f32.mrb[29].mxu0  ;;  %v1578_v63 = vadd.f32 %v2413_v59, %v1577_v60 }
 0xcf3   :  { %v1580_v62 = vpop.f32.mrb[30].mxu0 }
 0xcf4   :  { %v1581_v0 = vadd.f32 %v2413_v59, %v1580_v62  ;;  %v2804_v1 = vpop.f32.mrb[31].mxu0 }
 0xcf6   :  { %v1584_v5 = vpack.c.bf16 %v1581_v0, %v1578_v63 }
 0xcf8   :  { %2822 = vmatmul.mubr.bf16.vlgmr.msra.gmra.mrb[28].mxu1 %v1584_v5 }
 0xcf9   :  { %2846 = vmatpush3.bf16.msra.mxu1 %v3006_v3  ;;  %2861 = vmatprep.mubr.msk.bf16.mxu1 %vm3050_vm0, %v3049_v2 }
 0xcfa   :  { %2847 = vmatprep.subr.bf16.mxu1 %v3049_v2 }
 0xcfd   :  { %2848 = vmatpush3.bf16.msra.mxu1 %v3008_v6 }
 0xcfe   :  { %2849 = vmatprep.subr.bf16.mxu1 %v3049_v2 }
 0xd01   :  { %2850 = vmatpush3.bf16.msra.mxu1 %v3010_v7 }
 0xd02   :  { %2851 = vmatprep.subr.bf16.mxu1 %v3049_v2 }
 0xd05   :  { %2852 = vmatpush3.bf16.msra.mxu1 %v3012_v8 }
 0xd06   :  { %2853 = vmatprep.subr.bf16.mxu1 %v3049_v2 }
 0xd09   :  { %2854 = vmatpush3.bf16.msra.mxu1 %v3014_v9 }
 0xd0a   :  { %2855 = vmatprep.subr.bf16.mxu1 %v3049_v2 }
 0xd0d   :  { %2856 = vmatpush3.bf16.msra.mxu1 %v3016_v10 }
 0xd0e   :  { %2857 = vmatprep.subr.bf16.mxu1 %v3049_v2 }
 0xd11   :  { %2858 = vmatpush3.bf16.msra.mxu1 %v3018_v4 }
 0xd12   :  { %2859 = vmatprep.subr.bf16.mxu1 %v3049_v2 }
 0xd15   :  { %2860 = vmatpush3.bf16.msra.mxu1 %v3020_v14 }
 0xdcb   :  { %v1689_v16 = vpop.f32.mrb[28].mxu1 }
 0xdcc   :  { %v2823_v17 = vpop.f32.mrb[29].mxu1  ;;  %v1690_v19 = vadd.f32 %v2438_v15, %v1689_v16 }
 0xdcd   :  { %v1692_v18 = vpop.f32.mrb[30].mxu1 }
 0xdce   :  { %v1693_v20 = vadd.f32 %v2438_v15, %v1692_v18  ;;  %v2824_v2 = vpop.f32.mrb[31].mxu1 }
 0xdd0   :  { %v1696_v21 = vpack.c.bf16 %v1693_v20, %v1690_v19 }
 0xdd2   :  { %2842 = vmatmul.mubr.bf16.vlgmr.msra.gmra.mrb[32].mxu0 %v1696_v21  ;;  %2862 = vmatmul.mubr.bf16.vlgmr.msra.gmra.mrb[32].mxu1 %v1696_v21 }
 0xdd3   :  { %2869 = vmatprep.mubr.msk.f32.mxu0 %vm35_vm1, %v1919_v22 }
 0xea5   :  { %v1801_v23 = vpop.f32.mrb[32].mxu0  ;;  %v1912_v25 = vpop.f32.mrb[32].mxu1 }
 0xea6   :  { %v2843_v26 = vpop.f32.mrb[33].mxu0  ;;  %v2863_v27 = vpop.f32.mrb[33].mxu1  ;;  %v1802_v30 = vadd.f32 %v2463_v39, %v1801_v23  ;;  %v1913_v31 = vadd.f32 %v2488_v24, %v1912_v25 }
 0xea7   :  { %v1804_v28 = vpop.f32.mrb[34].mxu0  ;;  %v1915_v29 = vpop.f32.mrb[34].mxu1 }
 0xea8   :  { %v1805_v32 = vadd.f32 %v2463_v39, %v1804_v28  ;;  %v1916_v33 = vadd.f32 %v2488_v24, %v1915_v29  ;;  %v2844_v34 = vpop.f32.mrb[35].mxu0  ;;  %v2864_v35 = vpop.f32.mrb[35].mxu1 }
 0xeaa   :  { %v2879_v36 = vpack.c.bf16 %v1805_v32, %v1802_v30  ;;  %v2883_v37 = vpack.c.bf16 %v1916_v33, %v1913_v31 }
 0xeac   :  { %2880 = vmatprep.subr.bf16.mxu0 %v2879_v36 }
 0xead   :  { %2882 = vmatpush3.bf16.msra.mxu0 %v2879_v36 }
 0xeae   :  { %2884 = vmatprep.subr.bf16.mxu0 %v2883_v37 }
 0xeb0   :  { %2870 = vmatmul.mubr.msk.f32.vlgmr.msra.gmra.mrb[36].mxu0 %vm35_vm1, %v1920_v38 }
 0xeb1   :  { %2886 = vmatpush3.bf16.msra.mxu0 %v2883_v37  ;;  %2876 = vmatprep.mubr.msk.f32.mxu0 %vm35_vm1, %v2499_v40 }
 0xeb4   :  { %2877 = vmatmul.mubr.msk.f32.vlgmr.msra.gmra.mrb[38].mxu0 %vm35_vm1, %v2500_v41 }
 0xf83   :  { %v2871_v42 = vpop.f32.mrb[36].mxu0 }
 0xf84   :  { %v1993_v43 = vpop.f32.mrb[37].mxu0 }
 0xf87   :  { %v2878_v44 = vpop.f32.mrb[38].mxu0 }
 0xf88   :  { %v2087_v45 = vmul.f32 %v2878_v44, %v2871_v42  ;;  %v2077_v46 = vpop.f32.mrb[39].mxu0 }
 0xf89   :  { %v2086_v47 = vmul.f32 %v2077_v46, %v1993_v43 }
 0xf8a   :  { %v2094_v48 = vrot.slane %v2087_v45, 4 }
 0xf8b   :  { %v2088_v49 = vrot.slane %v2086_v47, 4 }
 0xf8c   :  { %v2095_v50 = vadd.f32 %v2094_v48, %v2087_v45 }
 0xf8d   :  { %v2089_v51 = vadd.f32 %v2088_v49, %v2086_v47 }
 0xf8e   :  { %v2096_v53 = vrot.slane %v2095_v50, 2 }
 0xf8f   :  { %v2090_v54 = vrot.slane %v2089_v51, 2 }
 0xf90   :  { %v2097_v55 = vadd.f32 %v2096_v53, %v2095_v50 }
 0xf91   :  { %v2091_v11 = vadd.f32 %v2090_v54, %v2089_v51 }
 0xf92   :  { %v2098_v57 = vrot.slane %v2097_v55, 1 }
 0xf93   :  { %v2092_v58 = vrot.slane %v2091_v11, 1 }
 0xf94   :  { %v2099_v59 = vadd.f32 %v2098_v57, %v2097_v55 }
 0xf95   :  { %v2093_v60 = vadd.f32 %v2092_v58, %v2091_v11 }
 0xf97   :  { %v2106_v61 = vsel %vm2105_vm2, %v2099_v59, %v2093_v60 }
 0xf98   :  { %v2108_v62 = vsel %vm2102_vm3, %v2106_v61, -1e+30 }
 0xf99   :  { %v2110_v63 = vsel %vm2109_vm4, %v2108_v62, -inf }
 0xf9a   :  { %2111 = vmax.xlane.f32.xlu0 %v2110_v63 }
0x1027   :  { %v2112_v0 = vpop.xlane.xlu0 %2111 }
0x1028   :  { %v2113_v1 = vsub.f32 %v2108_v62, %v2112_v0 }
0x102a   :  { %v2114_v3 = vmul.f32 1.442695, %v2113_v1 }
0x102c   :  { %3021 = vpow2.f32 %v2114_v3 }
0x1036   :  { %v3022_v5 = vpop.eup %3021 }
0x1037   :  { %v2116_v6 = vsel %vm2102_vm3, %v3022_v5, 0.0 }
0x1038   :  { %v2117_v7 = vsel %vm2109_vm4, %v2116_v6, 0.0 }
0x1039   :  { %2118 = vadd.xlane.f32.xlu0 %v2117_v7 }
0x10c6   :  { %v2119_v8 = vpop.xlane.xlu0 %2118 }
0x10c7   :  { %3023 = vrcp.f32 %v2119_v8 }
0x10d1   :  { %v3024_v9 = vpop.eup %3023 }
0x10d2   :  { %v2121_v10 = vmul.f32 %v3024_v9, %v2116_v6 }
0x10d4   :  { %2122 = vst [vmem:[#allocation2] sm:$0x3] %v2121_v10 }
0x10d5   :  { %3036 = shalt.err (!%p3033_p4)
}
0x10d6   :  { %s3037_s30 = scalar_lea.hbm %s3705_s6, 32 }
0x10d7   :  { %p3038_p5 = scmp.ne.s32.totalorder %s3705_s6, %s3037_s30  ;;  %p3041_p6 = scmp.lt.u32.totalorder %s3037_s30, %s3705_s6 }
0x10d9   :  { %p3043_p7 = pnand %p3041_p6, %p3038_p5 }
0x10db   :  { %3046 = shalt.err (!%p3043_p7)
}
0x10dc   :  { %2132 = dma.vmem_to_hbm [thread:$0]  %s2130_s28, 32, %s3705_s6, [#allocation3]  }
0x10dd   :  { %3047 = dma.done.wait [#allocation3], 32  }
0x10de   :  { %3048 = vsyncadd [#allocation3], 4294967264 }
0x10df   :  { %2136 = vsyncpa [#allocation3], 1 }

</bundles_post_ra>
